<compile_context>
chip_gen: v6e
topology: v6e:2x2x1
jax: 0.10.0
libtpu: 0.0.40
codegen_flags: <defaults>
</compile_context>

<pallas_src>
import jax
import jax.numpy as jnp
from jax.experimental import pallas as pl
from jax.experimental.pallas import tpu as pltpu


# ----------------------------------------------------------------------------
# helpers
# ----------------------------------------------------------------------------
def _round_up(x, m):
    return (x + m - 1) // m * m


def _pick_tile(n, prefs):
    """Largest tile from `prefs` that divides n (n is a multiple of prefs[-1])."""
    for t in prefs:
        if n % t == 0:
            return t
    return n


# ----------------------------------------------------------------------------
# dense kernel: y = x @ w + b   (bf16 operands, f32 accumulate)
# used for the hoisted input projection of every LSTM layer.
# ----------------------------------------------------------------------------
def _dense_bias_kernel(x_ref, w_ref, b_ref, o_ref):
    o_ref[...] = (
        jnp.dot(x_ref[...], w_ref[...], preferred_element_type=jnp.float32)
        + b_ref[...]
    )


def dense_bias(x, w, b):
    """x: [M, K] bf16; w: [K, N] bf16; b: [1, N] f32 -> [M, N] f32.
    M must be a multiple of 8 (guaranteed by the caller's padding)."""
    M, K = x.shape
    N = w.shape[1]
    TM = _pick_tile(M, (512, 256, 128, 64, 32, 16, 8))
    return pl.pallas_call(
        _dense_bias_kernel,
        out_shape=jax.ShapeDtypeStruct((M, N), jnp.float32),
        grid_spec=pltpu.PrefetchScalarGridSpec(
            num_scalar_prefetch=0,
            grid=(M // TM,),
            in_specs=[
                pl.BlockSpec((TM, K), lambda m: (m, 0)),
                pl.BlockSpec((K, N), lambda m: (0, 0)),
                pl.BlockSpec((1, N), lambda m: (0, 0)),
            ],
            out_specs=pl.BlockSpec((TM, N), lambda m: (m, 0)),
        ),
        compiler_params=pltpu.CompilerParams(
            dimension_semantics=("parallel",)),
    )(x, w, b)


# ----------------------------------------------------------------------------
# LSTM recurrence kernel: only h @ W_hh is left inside the time loop.
# grid = (batch blocks [parallel], time blocks [arbitrary]); Tt timesteps per
# grid step, unrolled; h/c carried across time blocks in VMEM scratch.
# ----------------------------------------------------------------------------
def _lstm_kernel(xp_ref, whh_ref, out_ref, h_ref, c_ref):
    @pl.when(pl.program_id(1) == 0)
    def _():
        h_ref[...] = jnp.zeros_like(h_ref)
        c_ref[...] = jnp.zeros_like(c_ref)

    nh = h_ref.shape[-1]
    tt = xp_ref.shape[0]

    def step(s, carry):
        # gates = (x @ W_ih + b)[t]  +  h @ W_hh      (gate math in f32)
        gates = xp_ref[s] + jnp.dot(
            h_ref[...].astype(jnp.bfloat16), whh_ref[...],
            preferred_element_type=jnp.float32)
        i = jax.nn.sigmoid(gates[:, 0 * nh:1 * nh])
        f = jax.nn.sigmoid(gates[:, 1 * nh:2 * nh])
        g = jnp.tanh(gates[:, 2 * nh:3 * nh])
        o = jax.nn.sigmoid(gates[:, 3 * nh:4 * nh])
        c_new = f * c_ref[...] + i * g
        h_new = o * jnp.tanh(c_new)
        c_ref[...] = c_new
        h_ref[...] = h_new
        out_ref[s] = h_new.astype(out_ref.dtype)
        return carry

    jax.lax.fori_loop(0, tt, step, 0, unroll=True)


def lstm_recurrence(x_proj, w_hh, *, TB, Tt):
    """x_proj: [T_p, B_p, 4*nhid] f32 (precomputed x@W_ih + b);
    w_hh: [nhid, 4*nhid] bf16.  Returns [T_p, B_p, nhid] bf16."""
    T_p, B_p, G = x_proj.shape
    nhid = w_hh.shape[0]
    return pl.pallas_call(
        _lstm_kernel,
        out_shape=jax.ShapeDtypeStruct((T_p, B_p, nhid), jnp.bfloat16),
        grid_spec=pltpu.PrefetchScalarGridSpec(
            num_scalar_prefetch=0,
            grid=(B_p // TB, T_p // Tt),
            in_specs=[
                pl.BlockSpec((Tt, TB, G), lambda b, t: (t, b, 0)),
                pl.BlockSpec((nhid, G), lambda b, t: (0, 0)),
            ],
            out_specs=pl.BlockSpec((Tt, TB, nhid), lambda b, t: (t, b, 0)),
            scratch_shapes=[
                pltpu.VMEM((TB, nhid), jnp.float32),   # h
                pltpu.VMEM((TB, nhid), jnp.float32),   # c
            ],
        ),
        compiler_params=pltpu.CompilerParams(
            dimension_semantics=("parallel", "arbitrary")),
    )(x_proj, w_hh)


# ----------------------------------------------------------------------------
# Decoder + masked cross-entropy, tiled over (row tiles, vocab tiles) with an
# online log-sum-exp accumulator (flash-style) so large vocabularies fit VMEM.
# Outputs per-position masked losses; caller sums and divides by #valid.
# ----------------------------------------------------------------------------
def _masked_ce_kernel(x_ref, tgt_ref, mask_ref, wd_ref, bd_ref, loss_ref,
                      m_ref, l_ref, t_ref):
    v = pl.program_id(1)

    @pl.when(v == 0)
    def _():
        m_ref[...] = jnp.full(m_ref.shape, -jnp.inf, jnp.float32)
        l_ref[...] = jnp.zeros_like(l_ref)
        t_ref[...] = jnp.zeros_like(t_ref)

    logits = (jnp.dot(x_ref[...], wd_ref[...],
                      preferred_element_type=jnp.float32)
              + bd_ref[...])                                    # [TN, TV] f32
    tv = logits.shape[1]

    m_prev = m_ref[...]
    m_new = jnp.maximum(m_prev, jnp.max(logits, axis=-1, keepdims=True))
    l_ref[...] = (jnp.exp(m_prev - m_new) * l_ref[...]
                  + jnp.sum(jnp.exp(logits - m_new), axis=-1, keepdims=True))
    m_ref[...] = m_new

    ids = jax.lax.broadcasted_iota(jnp.int32, logits.shape, 1) + v * tv
    t_ref[...] += jnp.sum(jnp.where(ids == tgt_ref[...], logits, 0.0),
                          axis=-1, keepdims=True)

    @pl.when(v == pl.num_programs(1) - 1)
    def _():
        loss_ref[...] = (m_ref[...] + jnp.log(l_ref[...]) - t_ref[...]) \
            * mask_ref[...]


def masked_ce(x, tgt, mask, w_dec, b_dec):
    """x: [N, nhid] bf16; tgt: [N, 1] int32; mask: [N, 1] f32;
    w_dec: [nhid, V] bf16; b_dec: [1, V] f32.
    Returns per-position masked CE losses [N, 1] f32."""
    N, nhid = x.shape
    V = w_dec.shape[1]

    TN = _pick_tile(N, (256, 128, 64, 32, 16, 8))
    Vp = _round_up(V, 128)
    if Vp != V:
        # pad the vocab: zero weights + very negative bias -> exp() == 0,
        # so padded columns never affect the log-sum-exp or the target pick.
        w_dec = jnp.pad(w_dec, ((0, 0), (0, Vp - V)))
        b_dec = jnp.pad(b_dec, ((0, 0), (0, Vp - V)), constant_values=-1e30)
    TV = _pick_tile(Vp, (2048, 1024, 512, 256, 128))

    return pl.pallas_call(
        _masked_ce_kernel,
        out_shape=jax.ShapeDtypeStruct((N, 1), jnp.float32),
        grid_spec=pltpu.PrefetchScalarGridSpec(
            num_scalar_prefetch=0,
            grid=(N // TN, Vp // TV),
            in_specs=[
                pl.BlockSpec((TN, nhid), lambda r, v: (r, 0)),
                pl.BlockSpec((TN, 1), lambda r, v: (r, 0)),
                pl.BlockSpec((TN, 1), lambda r, v: (r, 0)),
                pl.BlockSpec((nhid, TV), lambda r, v: (0, v)),
                pl.BlockSpec((1, TV), lambda r, v: (0, v)),
            ],
            out_specs=pl.BlockSpec((TN, 1), lambda r, v: (r, 0)),
            scratch_shapes=[
                pltpu.VMEM((TN, 1), jnp.float32),   # running max
                pltpu.VMEM((TN, 1), jnp.float32),   # running sum-exp
                pltpu.VMEM((TN, 1), jnp.float32),   # target logit
            ],
        ),
        compiler_params=pltpu.CompilerParams(
            dimension_semantics=("parallel", "arbitrary")),
    )(x, tgt, mask, w_dec, b_dec)


# ----------------------------------------------------------------------------
# RNNModel forward
# ----------------------------------------------------------------------------
def rnn_model_forward(params, tokens, target, lengths):
    """tokens: [B, T] int32, target: [B, T] int32, lengths: [B] int32.
    Returns scalar mean cross-entropy over valid positions."""
    B, T = tokens.shape
    nlayers = len(params["w_ih_t"])
    nhid = params["w_hh_t"][0].shape[0]

    # --- tile / padding choices (batch -> multiple of 8, time -> Tt blocks)
    B8 = _round_up(B, 8)
    if B8 >= 64:
        TB = 64
        B_p = _round_up(B8, 64)
    else:
        TB = B8
        B_p = B8
    Tt = 16 if T >= 16 else T
    T_p = _round_up(T, Tt)

    # --- time-major, padded tokens / target / mask (no big-activation transposes)
    tok_tm = jnp.pad(jnp.transpose(tokens, (1, 0)),
                     ((0, T_p - T), (0, B_p - B)))               # [T_p, B_p]
    tgt_tm = jnp.pad(jnp.transpose(target, (1, 0)),
                     ((0, T_p - T), (0, B_p - B)))               # [T_p, B_p]
    len_p = jnp.pad(lengths, (0, B_p - B))                       # [B_p]
    t_idx = jnp.arange(T_p, dtype=jnp.int32)[:, None]
    mask = (t_idx < len_p[None, :]).astype(jnp.float32)          # [T_p, B_p]

    # --- encoder (embedding gather, plain-JAX glue); dropout = identity (eval)
    emb = jnp.take(params["embedding"], tok_tm, axis=0).astype(jnp.bfloat16)

    # --- LSTM stack, time-major; input projection hoisted out of recurrence
    x = emb                                                      # [T_p, B_p, in]
    for layer in range(nlayers):
        in_dim = x.shape[-1]
        w_ih = params["w_ih_t"][layer].astype(jnp.bfloat16)      # [in, 4H]
        w_hh = params["w_hh_t"][layer].astype(jnp.bfloat16)      # [H, 4H]
        bias = params["bias"][layer]                             # [1, 4H] f32
        x_proj = dense_bias(x.reshape(T_p * B_p, in_dim), w_ih, bias)
        x_proj = x_proj.reshape(T_p, B_p, 4 * nhid)              # f32
        x = lstm_recurrence(x_proj, w_hh, TB=TB, Tt=Tt)          # bf16 [T_p,B_p,H]
        # inter-layer dropout: identity in eval mode.

    # --- decoder + masked CE, still time-major (no activation transpose)
    flat_out = x.reshape(T_p * B_p, nhid)                        # bf16
    flat_tgt = tgt_tm.reshape(T_p * B_p, 1).astype(jnp.int32)
    flat_mask = mask.reshape(T_p * B_p, 1)
    w_dec = params["w_dec_t"].astype(jnp.bfloat16)
    b_dec = params["b_dec"]

    per_pos = masked_ce(flat_out, flat_tgt, flat_mask, w_dec, b_dec)
    n_valid = jnp.maximum(jnp.sum(mask), 1.0)                    # guard /0
    return jnp.sum(per_pos) / n_valid


# ----------------------------------------------------------------------------
# Deterministic parameter construction (matches PyTorch module shapes).
# ----------------------------------------------------------------------------
def init_params(key, ntoken, ninp, nhid, nlayers):
    keys = jax.random.split(key, 2 + 4 * nlayers + 2)
    k = iter(keys)

    # encoder.weight ~ U(-0.1, 0.1)   [ntoken, ninp]
    embedding = jax.random.uniform(next(k), (ntoken, ninp),
                                   jnp.float32, -0.1, 0.1)

    w_ih_t, w_hh_t, bias = [], [], []
    bound = 1.0 / jnp.sqrt(nhid)
    for layer in range(nlayers):
        in_dim = ninp if layer == 0 else nhid
        w_ih = jax.random.uniform(next(k), (4 * nhid, in_dim),
                                  jnp.float32, -bound, bound)
        w_hh = jax.random.uniform(next(k), (4 * nhid, nhid),
                                  jnp.float32, -bound, bound)
        b_ih = jax.random.uniform(next(k), (4 * nhid,),
                                  jnp.float32, -bound, bound)
        b_hh = jax.random.uniform(next(k), (4 * nhid,),
                                  jnp.float32, -bound, bound)
        w_ih_t.append(w_ih.T)                    # [in_dim, 4*nhid]
        w_hh_t.append(w_hh.T)                    # [nhid, 4*nhid]
        bias.append((b_ih + b_hh)[None, :])      # [1, 4*nhid]

    # criterion (= linear decoder nhid -> ntoken + CE)
    w_dec = jax.random.uniform(next(k), (ntoken, nhid),
                               jnp.float32, -0.1, 0.1)
    b_dec = jnp.zeros((1, ntoken), jnp.float32)

    return {
        "embedding": embedding,
        "w_ih_t": w_ih_t,
        "w_hh_t": w_hh_t,
        "bias": bias,
        "w_dec_t": w_dec.T,                      # [nhid, ntoken]
        "b_dec": b_dec,
    }


if __name__ == "__main__":
    ntoken, ninp, nhid, nlayers = 50, 32, 32, 2
    B, T = 2, 8

    key = jax.random.PRNGKey(0)
    kp, kt, kg = jax.random.split(key, 3)
    params = init_params(kp, ntoken, ninp, nhid, nlayers)

    tokens = jax.random.randint(kt, (B, T), 0, ntoken, dtype=jnp.int32)
    target = jax.random.randint(kg, (B, T), 0, ntoken, dtype=jnp.int32)
    lengths = jnp.array([8, 5], dtype=jnp.int32)   # sorted descending

    loss = jax.jit(rnn_model_forward)(params, tokens, target, lengths)
    jax.block_until_ready(loss)
    assert loss.shape == () and bool(jnp.isfinite(loss))
    print("KERNEL_OK")
</pallas_src>

<mosaic_0001>
module attributes {stable_mosaic.version = 11 : i64} {
  func.func @_dense_bias_kernel(%arg0: i32, %arg1: memref<64x32xbf16, #tpu.memory_space<vmem>>, %arg2: memref<32x128xbf16, #tpu.memory_space<vmem>>, %arg3: memref<1x128xf32, #tpu.memory_space<vmem>>, %arg4: memref<64x128xf32, #tpu.memory_space<vmem>>) attributes {dimension_semantics = [#tpu.dimension_semantics<parallel>], iteration_bounds = array<i64: 1>, scalar_prefetch = 0 : i64, scratch_operands = 0 : i64, tpu.core_type = #tpu.core_type<tc>, window_params = [{transform_indices = @transform_0, window_bounds = array<i64: 64, 32>}, {pipeline_mode = #tpu.pipeline_mode<synchronous>, transform_indices = @transform_1, window_bounds = array<i64: 32, 128>}, {pipeline_mode = #tpu.pipeline_mode<synchronous>, transform_indices = @transform_2, window_bounds = array<i64: 1, 128>}, {transform_indices = @transform_3, window_bounds = array<i64: 64, 128>}]} {
    %c0 = arith.constant 0 : index
    %c0_0 = arith.constant 0 : index
    %0 = vector.load %arg1[%c0, %c0_0] : memref<64x32xbf16, #tpu.memory_space<vmem>>, vector<64x32xbf16>
    %c0_1 = arith.constant 0 : index
    %c0_2 = arith.constant 0 : index
    %1 = vector.load %arg2[%c0_1, %c0_2] : memref<32x128xbf16, #tpu.memory_space<vmem>>, vector<32x128xbf16>
    %cst = arith.constant dense<0.000000e+00> : vector<64x128xf32>
    %2 = tpu.matmul %0, %1, %cst {dimension_numbers = #tpu.dot_dimension_numbers<[1], [0], [0], [1], [0, 0, 1, 1], [], []>} : vector<64x32xbf16>, vector<32x128xbf16>, vector<64x128xf32> -> vector<64x128xf32>
    %c0_3 = arith.constant 0 : index
    %c0_4 = arith.constant 0 : index
    %3 = vector.load %arg3[%c0_3, %c0_4] : memref<1x128xf32, #tpu.memory_space<vmem>>, vector<1x128xf32>
    %4 = vector.broadcast %3 : vector<1x128xf32> to vector<64x128xf32>
    %5 = arith.addf %2, %4 : vector<64x128xf32>
    %c0_5 = arith.constant 0 : index
    %c0_6 = arith.constant 0 : index
    %6 = vector.load %arg4[%c0_5, %c0_6] : memref<64x128xf32, #tpu.memory_space<vmem>>, vector<64x128xf32>
    tpu.vector_store %arg4[%c0_5, %c0_6], %5 {strides = array<i32>} : memref<64x128xf32, #tpu.memory_space<vmem>>, vector<64x128xf32>,
    return
  }
  func.func @transform_0(%arg0: i32) -> (i32, i32) {
    %c0_i32 = arith.constant 0 : i32
    %c0_i32_0 = arith.constant 0 : i32
    return %arg0, %c0_i32 : i32, i32
  }
  func.func @transform_1(%arg0: i32) -> (i32, i32) {
    %c0_i32 = arith.constant 0 : i32
    %c0_i32_0 = arith.constant 0 : i32
    %c0_i32_1 = arith.constant 0 : i32
    return %c0_i32, %c0_i32_0 : i32, i32
  }
  func.func @transform_2(%arg0: i32) -> (i32, i32) {
    %c0_i32 = arith.constant 0 : i32
    %c0_i32_0 = arith.constant 0 : i32
    %c0_i32_1 = arith.constant 0 : i32
    return %c0_i32, %c0_i32_0 : i32, i32
  }
  func.func @transform_3(%arg0: i32) -> (i32, i32) {
    %c0_i32 = arith.constant 0 : i32
    %c0_i32_0 = arith.constant 0 : i32
    return %arg0, %c0_i32 : i32, i32
  }
}

module attributes {stable_mosaic.version = 11 : i64} {
  func.func @_lstm_kernel(%arg0: i32, %arg1: i32, %arg2: memref<8x8x128xf32, #tpu.memory_space<vmem>>, %arg3: memref<32x128xbf16, #tpu.memory_space<vmem>>, %arg4: memref<8x8x32xbf16, #tpu.memory_space<vmem>>, %arg5: memref<8x32xf32, #tpu.memory_space<vmem>>, %arg6: memref<8x32xf32, #tpu.memory_space<vmem>>) attributes {dimension_semantics = [#tpu.dimension_semantics<parallel>, #tpu.dimension_semantics<arbitrary>], iteration_bounds = array<i64: 1, 1>, scalar_prefetch = 0 : i64, scratch_operands = 2 : i64, tpu.core_type = #tpu.core_type<tc>, window_params = [{transform_indices = @transform_0, window_bounds = array<i64: 8, 8, 128>}, {pipeline_mode = #tpu.pipeline_mode<synchronous>, transform_indices = @transform_1, window_bounds = array<i64: 32, 128>}, {transform_indices = @transform_2, window_bounds = array<i64: 8, 8, 32>}]} {
    %c0_i32 = arith.constant 0 : i32
    %0 = arith.cmpi eq, %arg1, %c0_i32 : i32
    %1 = arith.extui %0 : i1 to i32
    %c0_i32_0 = arith.constant 0 : i32
    %2 = arith.cmpi ne, %1, %c0_i32_0 : i32
    scf.if %2 {
      %cst_144 = arith.constant 0.000000e+00 : f32
      %331 = vector.broadcast %cst_144 : f32 to vector<8x32xf32>
      %c0_145 = arith.constant 0 : index
      %c0_146 = arith.constant 0 : index
      %332 = vector.load %arg5[%c0_145, %c0_146] : memref<8x32xf32, #tpu.memory_space<vmem>>, vector<8x32xf32>
      tpu.vector_store %arg5[%c0_145, %c0_146], %331 {strides = array<i32>} : memref<8x32xf32, #tpu.memory_space<vmem>>, vector<8x32xf32>,
      %cst_147 = arith.constant 0.000000e+00 : f32
      %333 = vector.broadcast %cst_147 : f32 to vector<8x32xf32>
      %c0_148 = arith.constant 0 : index
      %c0_149 = arith.constant 0 : index
      %334 = vector.load %arg6[%c0_148, %c0_149] : memref<8x32xf32, #tpu.memory_space<vmem>>, vector<8x32xf32>
      tpu.vector_store %arg6[%c0_148, %c0_149], %333 {strides = array<i32>} : memref<8x32xf32, #tpu.memory_space<vmem>>, vector<8x32xf32>,
    } else {
    }
    %c0_i32_1 = arith.constant 0 : i32
    %3 = arith.index_cast %c0_i32_1 : i32 to index
    %c0 = arith.constant 0 : index
    %c0_2 = arith.constant 0 : index
    %4 = vector.load %arg2[%3, %c0, %c0_2] : memref<8x8x128xf32, #tpu.memory_space<vmem>>, vector<1x8x128xf32>
    %5 = vector.shape_cast %4 : vector<1x8x128xf32> to vector<8x128xf32>
    %c0_3 = arith.constant 0 : index
    %c0_4 = arith.constant 0 : index
    %6 = vector.load %arg5[%c0_3, %c0_4] : memref<8x32xf32, #tpu.memory_space<vmem>>, vector<8x32xf32>
    %7 = arith.truncf %6 : vector<8x32xf32> to vector<8x32xbf16>
    %c0_5 = arith.constant 0 : index
    %c0_6 = arith.constant 0 : index
    %8 = vector.load %arg3[%c0_5, %c0_6] : memref<32x128xbf16, #tpu.memory_space<vmem>>, vector<32x128xbf16>
    %cst = arith.constant dense<0.000000e+00> : vector<8x128xf32>
    %9 = tpu.matmul %7, %8, %cst {dimension_numbers = #tpu.dot_dimension_numbers<[1], [0], [0], [1], [0, 0, 1, 1], [], []>} : vector<8x32xbf16>, vector<32x128xbf16>, vector<8x128xf32> -> vector<8x128xf32>
    %10 = arith.addf %5, %9 : vector<8x128xf32>
    %11 = vector.extract_strided_slice %10 {offsets = [0, 0], sizes = [8, 32], strides = [1, 1]} : vector<8x128xf32> to vector<8x32xf32>
    %12 = arith.negf %11 : vector<8x32xf32>
    %13 = math.exp %12 : vector<8x32xf32>
    %cst_7 = arith.constant 1.000000e+00 : f32
    %14 = vector.broadcast %cst_7 : f32 to vector<8x32xf32>
    %15 = arith.addf %14, %13 : vector<8x32xf32>
    %16 = arith.divf %14, %15 : vector<8x32xf32>
    %17 = vector.extract_strided_slice %10 {offsets = [0, 32], sizes = [8, 32], strides = [1, 1]} : vector<8x128xf32> to vector<8x32xf32>
    %18 = arith.negf %17 : vector<8x32xf32>
    %19 = math.exp %18 : vector<8x32xf32>
    %cst_8 = arith.constant 1.000000e+00 : f32
    %20 = vector.broadcast %cst_8 : f32 to vector<8x32xf32>
    %21 = arith.addf %20, %19 : vector<8x32xf32>
    %22 = arith.divf %20, %21 : vector<8x32xf32>
    %23 = vector.extract_strided_slice %10 {offsets = [0, 64], sizes = [8, 32], strides = [1, 1]} : vector<8x128xf32> to vector<8x32xf32>
    %24 = math.tanh %23 : vector<8x32xf32>
    %25 = vector.extract_strided_slice %10 {offsets = [0, 96], sizes = [8, 32], strides = [1, 1]} : vector<8x128xf32> to vector<8x32xf32>
    %26 = arith.negf %25 : vector<8x32xf32>
    %27 = math.exp %26 : vector<8x32xf32>
    %cst_9 = arith.constant 1.000000e+00 : f32
    %28 = vector.broadcast %cst_9 : f32 to vector<8x32xf32>
    %29 = arith.addf %28, %27 : vector<8x32xf32>
    %30 = arith.divf %28, %29 : vector<8x32xf32>
    %c0_10 = arith.constant 0 : index
    %c0_11 = arith.constant 0 : index
    %31 = vector.load %arg6[%c0_10, %c0_11] : memref<8x32xf32, #tpu.memory_space<vmem>>, vector<8x32xf32>
    %32 = arith.mulf %22, %31 : vector<8x32xf32>
    %33 = arith.mulf %16, %24 : vector<8x32xf32>
    %34 = arith.addf %32, %33 : vector<8x32xf32>
    %35 = math.tanh %34 : vector<8x32xf32>
    %36 = arith.mulf %30, %35 : vector<8x32xf32>
    %c0_12 = arith.constant 0 : index
    %c0_13 = arith.constant 0 : index
    %37 = vector.load %arg6[%c0_12, %c0_13] : memref<8x32xf32, #tpu.memory_space<vmem>>, vector<8x32xf32>
    tpu.vector_store %arg6[%c0_12, %c0_13], %34 {strides = array<i32>} : memref<8x32xf32, #tpu.memory_space<vmem>>, vector<8x32xf32>,
    %c0_14 = arith.constant 0 : index
    %c0_15 = arith.constant 0 : index
    %38 = vector.load %arg5[%c0_14, %c0_15] : memref<8x32xf32, #tpu.memory_space<vmem>>, vector<8x32xf32>
    tpu.vector_store %arg5[%c0_14, %c0_15], %36 {strides = array<i32>} : memref<8x32xf32, #tpu.memory_space<vmem>>, vector<8x32xf32>,
    %39 = arith.truncf %36 : vector<8x32xf32> to vector<8x32xbf16>
    %40 = arith.index_cast %c0_i32_1 : i32 to index
    %c0_16 = arith.constant 0 : index
    %c0_17 = arith.constant 0 : index
    %41 = vector.load %arg4[%40, %c0_16, %c0_17] : memref<8x8x32xbf16, #tpu.memory_space<vmem>>, vector<1x8x32xbf16>
    %42 = vector.shape_cast %41 : vector<1x8x32xbf16> to vector<8x32xbf16>
    %43 = vector.shape_cast %39 : vector<8x32xbf16> to vector<1x8x32xbf16>
    tpu.vector_store %arg4[%40, %c0_16, %c0_17], %43 {strides = array<i32>} : memref<8x8x32xbf16, #tpu.memory_space<vmem>>, vector<1x8x32xbf16>,
    %c1_i32 = arith.constant 1 : i32
    %44 = arith.index_cast %c1_i32 : i32 to index
    %c0_18 = arith.constant 0 : index
    %c0_19 = arith.constant 0 : index
    %45 = vector.load %arg2[%44, %c0_18, %c0_19] : memref<8x8x128xf32, #tpu.memory_space<vmem>>, vector<1x8x128xf32>
    %46 = vector.shape_cast %45 : vector<1x8x128xf32> to vector<8x128xf32>
    %c0_20 = arith.constant 0 : index
    %c0_21 = arith.constant 0 : index
    %47 = vector.load %arg5[%c0_20, %c0_21] : memref<8x32xf32, #tpu.memory_space<vmem>>, vector<8x32xf32>
    %48 = arith.truncf %47 : vector<8x32xf32> to vector<8x32xbf16>
    %c0_22 = arith.constant 0 : index
    %c0_23 = arith.constant 0 : index
    %49 = vector.load %arg3[%c0_22, %c0_23] : memref<32x128xbf16, #tpu.memory_space<vmem>>, vector<32x128xbf16>
    %cst_24 = arith.constant dense<0.000000e+00> : vector<8x128xf32>
    %50 = tpu.matmul %48, %49, %cst_24 {dimension_numbers = #tpu.dot_dimension_numbers<[1], [0], [0], [1], [0, 0, 1, 1], [], []>} : vector<8x32xbf16>, vector<32x128xbf16>, vector<8x128xf32> -> vector<8x128xf32>
    %51 = arith.addf %46, %50 : vector<8x128xf32>
    %52 = vector.extract_strided_slice %51 {offsets = [0, 0], sizes = [8, 32], strides = [1, 1]} : vector<8x128xf32> to vector<8x32xf32>
    %53 = arith.negf %52 : vector<8x32xf32>
    %54 = math.exp %53 : vector<8x32xf32>
    %cst_25 = arith.constant 1.000000e+00 : f32
    %55 = vector.broadcast %cst_25 : f32 to vector<8x32xf32>
    %56 = arith.addf %55, %54 : vector<8x32xf32>
    %57 = arith.divf %55, %56 : vector<8x32xf32>
    %58 = vector.extract_strided_slice %51 {offsets = [0, 32], sizes = [8, 32], strides = [1, 1]} : vector<8x128xf32> to vector<8x32xf32>
    %59 = arith.negf %58 : vector<8x32xf32>
    %60 = math.exp %59 : vector<8x32xf32>
    %cst_26 = arith.constant 1.000000e+00 : f32
    %61 = vector.broadcast %cst_26 : f32 to vector<8x32xf32>
    %62 = arith.addf %61, %60 : vector<8x32xf32>
    %63 = arith.divf %61, %62 : vector<8x32xf32>
    %64 = vector.extract_strided_slice %51 {offsets = [0, 64], sizes = [8, 32], strides = [1, 1]} : vector<8x128xf32> to vector<8x32xf32>
    %65 = math.tanh %64 : vector<8x32xf32>
    %66 = vector.extract_strided_slice %51 {offsets = [0, 96], sizes = [8, 32], strides = [1, 1]} : vector<8x128xf32> to vector<8x32xf32>
    %67 = arith.negf %66 : vector<8x32xf32>
    %68 = math.exp %67 : vector<8x32xf32>
    %cst_27 = arith.constant 1.000000e+00 : f32
    %69 = vector.broadcast %cst_27 : f32 to vector<8x32xf32>
    %70 = arith.addf %69, %68 : vector<8x32xf32>
    %71 = arith.divf %69, %70 : vector<8x32xf32>
    %c0_28 = arith.constant 0 : index
    %c0_29 = arith.constant 0 : index
    %72 = vector.load %arg6[%c0_28, %c0_29] : memref<8x32xf32, #tpu.memory_space<vmem>>, vector<8x32xf32>
    %73 = arith.mulf %63, %72 : vector<8x32xf32>
    %74 = arith.mulf %57, %65 : vector<8x32xf32>
    %75 = arith.addf %73, %74 : vector<8x32xf32>
    %76 = math.tanh %75 : vector<8x32xf32>
    %77 = arith.mulf %71, %76 : vector<8x32xf32>
    %c0_30 = arith.constant 0 : index
    %c0_31 = arith.constant 0 : index
    %78 = vector.load %arg6[%c0_30, %c0_31] : memref<8x32xf32, #tpu.memory_space<vmem>>, vector<8x32xf32>
    tpu.vector_store %arg6[%c0_30, %c0_31], %75 {strides = array<i32>} : memref<8x32xf32, #tpu.memory_space<vmem>>, vector<8x32xf32>,
    %c0_32 = arith.constant 0 : index
    %c0_33 = arith.constant 0 : index
    %79 = vector.load %arg5[%c0_32, %c0_33] : memref<8x32xf32, #tpu.memory_space<vmem>>, vector<8x32xf32>
    tpu.vector_store %arg5[%c0_32, %c0_33], %77 {strides = array<i32>} : memref<8x32xf32, #tpu.memory_space<vmem>>, vector<8x32xf32>,
    %80 = arith.truncf %77 : vector<8x32xf32> to vector<8x32xbf16>
    %81 = arith.index_cast %c1_i32 : i32 to index
    %c0_34 = arith.constant 0 : index
    %c0_35 = arith.constant 0 : index
    %82 = vector.load %arg4[%81, %c0_34, %c0_35] : memref<8x8x32xbf16, #tpu.memory_space<vmem>>, vector<1x8x32xbf16>
    %83 = vector.shape_cast %82 : vector<1x8x32xbf16> to vector<8x32xbf16>
    %84 = vector.shape_cast %80 : vector<8x32xbf16> to vector<1x8x32xbf16>
    tpu.vector_store %arg4[%81, %c0_34, %c0_35], %84 {strides = array<i32>} : memref<8x8x32xbf16, #tpu.memory_space<vmem>>, vector<1x8x32xbf16>,
    %c2_i32 = arith.constant 2 : i32
    %85 = arith.index_cast %c2_i32 : i32 to index
    %c0_36 = arith.constant 0 : index
    %c0_37 = arith.constant 0 : index
    %86 = vector.load %arg2[%85, %c0_36, %c0_37] : memref<8x8x128xf32, #tpu.memory_space<vmem>>, vector<1x8x128xf32>
    %87 = vector.shape_cast %86 : vector<1x8x128xf32> to vector<8x128xf32>
    %c0_38 = arith.constant 0 : index
    %c0_39 = arith.constant 0 : index
    %88 = vector.load %arg5[%c0_38, %c0_39] : memref<8x32xf32, #tpu.memory_space<vmem>>, vector<8x32xf32>
    %89 = arith.truncf %88 : vector<8x32xf32> to vector<8x32xbf16>
    %c0_40 = arith.constant 0 : index
    %c0_41 = arith.constant 0 : index
    %90 = vector.load %arg3[%c0_40, %c0_41] : memref<32x128xbf16, #tpu.memory_space<vmem>>, vector<32x128xbf16>
    %cst_42 = arith.constant dense<0.000000e+00> : vector<8x128xf32>
    %91 = tpu.matmul %89, %90, %cst_42 {dimension_numbers = #tpu.dot_dimension_numbers<[1], [0], [0], [1], [0, 0, 1, 1], [], []>} : vector<8x32xbf16>, vector<32x128xbf16>, vector<8x128xf32> -> vector<8x128xf32>
    %92 = arith.addf %87, %91 : vector<8x128xf32>
    %93 = vector.extract_strided_slice %92 {offsets = [0, 0], sizes = [8, 32], strides = [1, 1]} : vector<8x128xf32> to vector<8x32xf32>
    %94 = arith.negf %93 : vector<8x32xf32>
    %95 = math.exp %94 : vector<8x32xf32>
    %cst_43 = arith.constant 1.000000e+00 : f32
    %96 = vector.broadcast %cst_43 : f32 to vector<8x32xf32>
    %97 = arith.addf %96, %95 : vector<8x32xf32>
    %98 = arith.divf %96, %97 : vector<8x32xf32>
    %99 = vector.extract_strided_slice %92 {offsets = [0, 32], sizes = [8, 32], strides = [1, 1]} : vector<8x128xf32> to vector<8x32xf32>
    %100 = arith.negf %99 : vector<8x32xf32>
    %101 = math.exp %100 : vector<8x32xf32>
    %cst_44 = arith.constant 1.000000e+00 : f32
    %102 = vector.broadcast %cst_44 : f32 to vector<8x32xf32>
    %103 = arith.addf %102, %101 : vector<8x32xf32>
    %104 = arith.divf %102, %103 : vector<8x32xf32>
    %105 = vector.extract_strided_slice %92 {offsets = [0, 64], sizes = [8, 32], strides = [1, 1]} : vector<8x128xf32> to vector<8x32xf32>
    %106 = math.tanh %105 : vector<8x32xf32>
    %107 = vector.extract_strided_slice %92 {offsets = [0, 96], sizes = [8, 32], strides = [1, 1]} : vector<8x128xf32> to vector<8x32xf32>
    %108 = arith.negf %107 : vector<8x32xf32>
    %109 = math.exp %108 : vector<8x32xf32>
    %cst_45 = arith.constant 1.000000e+00 : f32
    %110 = vector.broadcast %cst_45 : f32 to vector<8x32xf32>
    %111 = arith.addf %110, %109 : vector<8x32xf32>
    %112 = arith.divf %110, %111 : vector<8x32xf32>
    %c0_46 = arith.constant 0 : index
    %c0_47 = arith.constant 0 : index
    %113 = vector.load %arg6[%c0_46, %c0_47] : memref<8x32xf32, #tpu.memory_space<vmem>>, vector<8x32xf32>
    %114 = arith.mulf %104, %113 : vector<8x32xf32>
    %115 = arith.mulf %98, %106 : vector<8x32xf32>
    %116 = arith.addf %114, %115 : vector<8x32xf32>
    %117 = math.tanh %116 : vector<8x32xf32>
    %118 = arith.mulf %112, %117 : vector<8x32xf32>
    %c0_48 = arith.constant 0 : index
    %c0_49 = arith.constant 0 : index
    %119 = vector.load %arg6[%c0_48, %c0_49] : memref<8x32xf32, #tpu.memory_space<vmem>>, vector<8x32xf32>
    tpu.vector_store %arg6[%c0_48, %c0_49], %116 {strides = array<i32>} : memref<8x32xf32, #tpu.memory_space<vmem>>, vector<8x32xf32>,
    %c0_50 = arith.constant 0 : index
    %c0_51 = arith.constant 0 : index
    %120 = vector.load %arg5[%c0_50, %c0_51] : memref<8x32xf32, #tpu.memory_space<vmem>>, vector<8x32xf32>
    tpu.vector_store %arg5[%c0_50, %c0_51], %118 {strides = array<i32>} : memref<8x32xf32, #tpu.memory_space<vmem>>, vector<8x32xf32>,
    %121 = arith.truncf %118 : vector<8x32xf32> to vector<8x32xbf16>
    %122 = arith.index_cast %c2_i32 : i32 to index
    %c0_52 = arith.constant 0 : index
    %c0_53 = arith.constant 0 : index
    %123 = vector.load %arg4[%122, %c0_52, %c0_53] : memref<8x8x32xbf16, #tpu.memory_space<vmem>>, vector<1x8x32xbf16>
    %124 = vector.shape_cast %123 : vector<1x8x32xbf16> to vector<8x32xbf16>
    %125 = vector.shape_cast %121 : vector<8x32xbf16> to vector<1x8x32xbf16>
    tpu.vector_store %arg4[%122, %c0_52, %c0_53], %125 {strides = array<i32>} : memref<8x8x32xbf16, #tpu.memory_space<vmem>>, vector<1x8x32xbf16>,
    %c3_i32 = arith.constant 3 : i32
    %126 = arith.index_cast %c3_i32 : i32 to index
    %c0_54 = arith.constant 0 : index
    %c0_55 = arith.constant 0 : index
    %127 = vector.load %arg2[%126, %c0_54, %c0_55] : memref<8x8x128xf32, #tpu.memory_space<vmem>>, vector<1x8x128xf32>
    %128 = vector.shape_cast %127 : vector<1x8x128xf32> to vector<8x128xf32>
    %c0_56 = arith.constant 0 : index
    %c0_57 = arith.constant 0 : index
    %129 = vector.load %arg5[%c0_56, %c0_57] : memref<8x32xf32, #tpu.memory_space<vmem>>, vector<8x32xf32>
    %130 = arith.truncf %129 : vector<8x32xf32> to vector<8x32xbf16>
    %c0_58 = arith.constant 0 : index
    %c0_59 = arith.constant 0 : index
    %131 = vector.load %arg3[%c0_58, %c0_59] : memref<32x128xbf16, #tpu.memory_space<vmem>>, vector<32x128xbf16>
    %cst_60 = arith.constant dense<0.000000e+00> : vector<8x128xf32>
    %132 = tpu.matmul %130, %131, %cst_60 {dimension_numbers = #tpu.dot_dimension_numbers<[1], [0], [0], [1], [0, 0, 1, 1], [], []>} : vector<8x32xbf16>, vector<32x128xbf16>, vector<8x128xf32> -> vector<8x128xf32>
    %133 = arith.addf %128, %132 : vector<8x128xf32>
    %134 = vector.extract_strided_slice %133 {offsets = [0, 0], sizes = [8, 32], strides = [1, 1]} : vector<8x128xf32> to vector<8x32xf32>
    %135 = arith.negf %134 : vector<8x32xf32>
    %136 = math.exp %135 : vector<8x32xf32>
    %cst_61 = arith.constant 1.000000e+00 : f32
    %137 = vector.broadcast %cst_61 : f32 to vector<8x32xf32>
    %138 = arith.addf %137, %136 : vector<8x32xf32>
    %139 = arith.divf %137, %138 : vector<8x32xf32>
    %140 = vector.extract_strided_slice %133 {offsets = [0, 32], sizes = [8, 32], strides = [1, 1]} : vector<8x128xf32> to vector<8x32xf32>
    %141 = arith.negf %140 : vector<8x32xf32>
    %142 = math.exp %141 : vector<8x32xf32>
    %cst_62 = arith.constant 1.000000e+00 : f32
    %143 = vector.broadcast %cst_62 : f32 to vector<8x32xf32>
    %144 = arith.addf %143, %142 : vector<8x32xf32>
    %145 = arith.divf %143, %144 : vector<8x32xf32>
    %146 = vector.extract_strided_slice %133 {offsets = [0, 64], sizes = [8, 32], strides = [1, 1]} : vector<8x128xf32> to vector<8x32xf32>
    %147 = math.tanh %146 : vector<8x32xf32>
    %148 = vector.extract_strided_slice %133 {offsets = [0, 96], sizes = [8, 32], strides = [1, 1]} : vector<8x128xf32> to vector<8x32xf32>
    %149 = arith.negf %148 : vector<8x32xf32>
    %150 = math.exp %149 : vector<8x32xf32>
    %cst_63 = arith.constant 1.000000e+00 : f32
    %151 = vector.broadcast %cst_63 : f32 to vector<8x32xf32>
    %152 = arith.addf %151, %150 : vector<8x32xf32>
    %153 = arith.divf %151, %152 : vector<8x32xf32>
    %c0_64 = arith.constant 0 : index
    %c0_65 = arith.constant 0 : index
    %154 = vector.load %arg6[%c0_64, %c0_65] : memref<8x32xf32, #tpu.memory_space<vmem>>, vector<8x32xf32>
    %155 = arith.mulf %145, %154 : vector<8x32xf32>
    %156 = arith.mulf %139, %147 : vector<8x32xf32>
    %157 = arith.addf %155, %156 : vector<8x32xf32>
    %158 = math.tanh %157 : vector<8x32xf32>
    %159 = arith.mulf %153, %158 : vector<8x32xf32>
    %c0_66 = arith.constant 0 : index
    %c0_67 = arith.constant 0 : index
    %160 = vector.load %arg6[%c0_66, %c0_67] : memref<8x32xf32, #tpu.memory_space<vmem>>, vector<8x32xf32>
    tpu.vector_store %arg6[%c0_66, %c0_67], %157 {strides = array<i32>} : memref<8x32xf32, #tpu.memory_space<vmem>>, vector<8x32xf32>,
    %c0_68 = arith.constant 0 : index
    %c0_69 = arith.constant 0 : index
    %161 = vector.load %arg5[%c0_68, %c0_69] : memref<8x32xf32, #tpu.memory_space<vmem>>, vector<8x32xf32>
    tpu.vector_store %arg5[%c0_68, %c0_69], %159 {strides = array<i32>} : memref<8x32xf32, #tpu.memory_space<vmem>>, vector<8x32xf32>,
    %162 = arith.truncf %159 : vector<8x32xf32> to vector<8x32xbf16>
    %163 = arith.index_cast %c3_i32 : i32 to index
    %c0_70 = arith.constant 0 : index
    %c0_71 = arith.constant 0 : index
    %164 = vector.load %arg4[%163, %c0_70, %c0_71] : memref<8x8x32xbf16, #tpu.memory_space<vmem>>, vector<1x8x32xbf16>
    %165 = vector.shape_cast %164 : vector<1x8x32xbf16> to vector<8x32xbf16>
    %166 = vector.shape_cast %162 : vector<8x32xbf16> to vector<1x8x32xbf16>
    tpu.vector_store %arg4[%163, %c0_70, %c0_71], %166 {strides = array<i32>} : memref<8x8x32xbf16, #tpu.memory_space<vmem>>, vector<1x8x32xbf16>,
    %c4_i32 = arith.constant 4 : i32
    %167 = arith.index_cast %c4_i32 : i32 to index
    %c0_72 = arith.constant 0 : index
    %c0_73 = arith.constant 0 : index
    %168 = vector.load %arg2[%167, %c0_72, %c0_73] : memref<8x8x128xf32, #tpu.memory_space<vmem>>, vector<1x8x128xf32>
    %169 = vector.shape_cast %168 : vector<1x8x128xf32> to vector<8x128xf32>
    %c0_74 = arith.constant 0 : index
    %c0_75 = arith.constant 0 : index
    %170 = vector.load %arg5[%c0_74, %c0_75] : memref<8x32xf32, #tpu.memory_space<vmem>>, vector<8x32xf32>
    %171 = arith.truncf %170 : vector<8x32xf32> to vector<8x32xbf16>
    %c0_76 = arith.constant 0 : index
    %c0_77 = arith.constant 0 : index
    %172 = vector.load %arg3[%c0_76, %c0_77] : memref<32x128xbf16, #tpu.memory_space<vmem>>, vector<32x128xbf16>
    %cst_78 = arith.constant dense<0.000000e+00> : vector<8x128xf32>
    %173 = tpu.matmul %171, %172, %cst_78 {dimension_numbers = #tpu.dot_dimension_numbers<[1], [0], [0], [1], [0, 0, 1, 1], [], []>} : vector<8x32xbf16>, vector<32x128xbf16>, vector<8x128xf32> -> vector<8x128xf32>
    %174 = arith.addf %169, %173 : vector<8x128xf32>
    %175 = vector.extract_strided_slice %174 {offsets = [0, 0], sizes = [8, 32], strides = [1, 1]} : vector<8x128xf32> to vector<8x32xf32>
    %176 = arith.negf %175 : vector<8x32xf32>
    %177 = math.exp %176 : vector<8x32xf32>
    %cst_79 = arith.constant 1.000000e+00 : f32
    %178 = vector.broadcast %cst_79 : f32 to vector<8x32xf32>
    %179 = arith.addf %178, %177 : vector<8x32xf32>
    %180 = arith.divf %178, %179 : vector<8x32xf32>
    %181 = vector.extract_strided_slice %174 {offsets = [0, 32], sizes = [8, 32], strides = [1, 1]} : vector<8x128xf32> to vector<8x32xf32>
    %182 = arith.negf %181 : vector<8x32xf32>
    %183 = math.exp %182 : vector<8x32xf32>
    %cst_80 = arith.constant 1.000000e+00 : f32
    %184 = vector.broadcast %cst_80 : f32 to vector<8x32xf32>
    %185 = arith.addf %184, %183 : vector<8x32xf32>
    %186 = arith.divf %184, %185 : vector<8x32xf32>
    %187 = vector.extract_strided_slice %174 {offsets = [0, 64], sizes = [8, 32], strides = [1, 1]} : vector<8x128xf32> to vector<8x32xf32>
    %188 = math.tanh %187 : vector<8x32xf32>
    %189 = vector.extract_strided_slice %174 {offsets = [0, 96], sizes = [8, 32], strides = [1, 1]} : vector<8x128xf32> to vector<8x32xf32>
    %190 = arith.negf %189 : vector<8x32xf32>
    %191 = math.exp %190 : vector<8x32xf32>
    %cst_81 = arith.constant 1.000000e+00 : f32
    %192 = vector.broadcast %cst_81 : f32 to vector<8x32xf32>
    %193 = arith.addf %192, %191 : vector<8x32xf32>
    %194 = arith.divf %192, %193 : vector<8x32xf32>
    %c0_82 = arith.constant 0 : index
    %c0_83 = arith.constant 0 : index
    %195 = vector.load %arg6[%c0_82, %c0_83] : memref<8x32xf32, #tpu.memory_space<vmem>>, vector<8x32xf32>
    %196 = arith.mulf %186, %195 : vector<8x32xf32>
    %197 = arith.mulf %180, %188 : vector<8x32xf32>
    %198 = arith.addf %196, %197 : vector<8x32xf32>
    %199 = math.tanh %198 : vector<8x32xf32>
    %200 = arith.mulf %194, %199 : vector<8x32xf32>
    %c0_84 = arith.constant 0 : index
    %c0_85 = arith.constant 0 : index
    %201 = vector.load %arg6[%c0_84, %c0_85] : memref<8x32xf32, #tpu.memory_space<vmem>>, vector<8x32xf32>
    tpu.vector_store %arg6[%c0_84, %c0_85], %198 {strides = array<i32>} : memref<8x32xf32, #tpu.memory_space<vmem>>, vector<8x32xf32>,
    %c0_86 = arith.constant 0 : index
    %c0_87 = arith.constant 0 : index
    %202 = vector.load %arg5[%c0_86, %c0_87] : memref<8x32xf32, #tpu.memory_space<vmem>>, vector<8x32xf32>
    tpu.vector_store %arg5[%c0_86, %c0_87], %200 {strides = array<i32>} : memref<8x32xf32, #tpu.memory_space<vmem>>, vector<8x32xf32>,
    %203 = arith.truncf %200 : vector<8x32xf32> to vector<8x32xbf16>
    %204 = arith.index_cast %c4_i32 : i32 to index
    %c0_88 = arith.constant 0 : index
    %c0_89 = arith.constant 0 : index
    %205 = vector.load %arg4[%204, %c0_88, %c0_89] : memref<8x8x32xbf16, #tpu.memory_space<vmem>>, vector<1x8x32xbf16>
    %206 = vector.shape_cast %205 : vector<1x8x32xbf16> to vector<8x32xbf16>
    %207 = vector.shape_cast %203 : vector<8x32xbf16> to vector<1x8x32xbf16>
    tpu.vector_store %arg4[%204, %c0_88, %c0_89], %207 {strides = array<i32>} : memref<8x8x32xbf16, #tpu.memory_space<vmem>>, vector<1x8x32xbf16>,
    %c5_i32 = arith.constant 5 : i32
    %208 = arith.index_cast %c5_i32 : i32 to index
    %c0_90 = arith.constant 0 : index
    %c0_91 = arith.constant 0 : index
    %209 = vector.load %arg2[%208, %c0_90, %c0_91] : memref<8x8x128xf32, #tpu.memory_space<vmem>>, vector<1x8x128xf32>
    %210 = vector.shape_cast %209 : vector<1x8x128xf32> to vector<8x128xf32>
    %c0_92 = arith.constant 0 : index
    %c0_93 = arith.constant 0 : index
    %211 = vector.load %arg5[%c0_92, %c0_93] : memref<8x32xf32, #tpu.memory_space<vmem>>, vector<8x32xf32>
    %212 = arith.truncf %211 : vector<8x32xf32> to vector<8x32xbf16>
    %c0_94 = arith.constant 0 : index
    %c0_95 = arith.constant 0 : index
    %213 = vector.load %arg3[%c0_94, %c0_95] : memref<32x128xbf16, #tpu.memory_space<vmem>>, vector<32x128xbf16>
    %cst_96 = arith.constant dense<0.000000e+00> : vector<8x128xf32>
    %214 = tpu.matmul %212, %213, %cst_96 {dimension_numbers = #tpu.dot_dimension_numbers<[1], [0], [0], [1], [0, 0, 1, 1], [], []>} : vector<8x32xbf16>, vector<32x128xbf16>, vector<8x128xf32> -> vector<8x128xf32>
    %215 = arith.addf %210, %214 : vector<8x128xf32>
    %216 = vector.extract_strided_slice %215 {offsets = [0, 0], sizes = [8, 32], strides = [1, 1]} : vector<8x128xf32> to vector<8x32xf32>
    %217 = arith.negf %216 : vector<8x32xf32>
    %218 = math.exp %217 : vector<8x32xf32>
    %cst_97 = arith.constant 1.000000e+00 : f32
    %219 = vector.broadcast %cst_97 : f32 to vector<8x32xf32>
    %220 = arith.addf %219, %218 : vector<8x32xf32>
    %221 = arith.divf %219, %220 : vector<8x32xf32>
    %222 = vector.extract_strided_slice %215 {offsets = [0, 32], sizes = [8, 32], strides = [1, 1]} : vector<8x128xf32> to vector<8x32xf32>
    %223 = arith.negf %222 : vector<8x32xf32>
    %224 = math.exp %223 : vector<8x32xf32>
    %cst_98 = arith.constant 1.000000e+00 : f32
    %225 = vector.broadcast %cst_98 : f32 to vector<8x32xf32>
    %226 = arith.addf %225, %224 : vector<8x32xf32>
    %227 = arith.divf %225, %226 : vector<8x32xf32>
    %228 = vector.extract_strided_slice %215 {offsets = [0, 64], sizes = [8, 32], strides = [1, 1]} : vector<8x128xf32> to vector<8x32xf32>
    %229 = math.tanh %228 : vector<8x32xf32>
    %230 = vector.extract_strided_slice %215 {offsets = [0, 96], sizes = [8, 32], strides = [1, 1]} : vector<8x128xf32> to vector<8x32xf32>
    %231 = arith.negf %230 : vector<8x32xf32>
    %232 = math.exp %231 : vector<8x32xf32>
    %cst_99 = arith.constant 1.000000e+00 : f32
    %233 = vector.broadcast %cst_99 : f32 to vector<8x32xf32>
    %234 = arith.addf %233, %232 : vector<8x32xf32>
    %235 = arith.divf %233, %234 : vector<8x32xf32>
    %c0_100 = arith.constant 0 : index
    %c0_101 = arith.constant 0 : index
    %236 = vector.load %arg6[%c0_100, %c0_101] : memref<8x32xf32, #tpu.memory_space<vmem>>, vector<8x32xf32>
    %237 = arith.mulf %227, %236 : vector<8x32xf32>
    %238 = arith.mulf %221, %229 : vector<8x32xf32>
    %239 = arith.addf %237, %238 : vector<8x32xf32>
    %240 = math.tanh %239 : vector<8x32xf32>
    %241 = arith.mulf %235, %240 : vector<8x32xf32>
    %c0_102 = arith.constant 0 : index
    %c0_103 = arith.constant 0 : index
    %242 = vector.load %arg6[%c0_102, %c0_103] : memref<8x32xf32, #tpu.memory_space<vmem>>, vector<8x32xf32>
    tpu.vector_store %arg6[%c0_102, %c0_103], %239 {strides = array<i32>} : memref<8x32xf32, #tpu.memory_space<vmem>>, vector<8x32xf32>,
    %c0_104 = arith.constant 0 : index
    %c0_105 = arith.constant 0 : index
    %243 = vector.load %arg5[%c0_104, %c0_105] : memref<8x32xf32, #tpu.memory_space<vmem>>, vector<8x32xf32>
    tpu.vector_store %arg5[%c0_104, %c0_105], %241 {strides = array<i32>} : memref<8x32xf32, #tpu.memory_space<vmem>>, vector<8x32xf32>,
    %244 = arith.truncf %241 : vector<8x32xf32> to vector<8x32xbf16>
    %245 = arith.index_cast %c5_i32 : i32 to index
    %c0_106 = arith.constant 0 : index
    %c0_107 = arith.constant 0 : index
    %246 = vector.load %arg4[%245, %c0_106, %c0_107] : memref<8x8x32xbf16, #tpu.memory_space<vmem>>, vector<1x8x32xbf16>
    %247 = vector.shape_cast %246 : vector<1x8x32xbf16> to vector<8x32xbf16>
    %248 = vector.shape_cast %244 : vector<8x32xbf16> to vector<1x8x32xbf16>
    tpu.vector_store %arg4[%245, %c0_106, %c0_107], %248 {strides = array<i32>} : memref<8x8x32xbf16, #tpu.memory_space<vmem>>, vector<1x8x32xbf16>,
    %c6_i32 = arith.constant 6 : i32
    %249 = arith.index_cast %c6_i32 : i32 to index
    %c0_108 = arith.constant 0 : index
    %c0_109 = arith.constant 0 : index
    %250 = vector.load %arg2[%249, %c0_108, %c0_109] : memref<8x8x128xf32, #tpu.memory_space<vmem>>, vector<1x8x128xf32>
    %251 = vector.shape_cast %250 : vector<1x8x128xf32> to vector<8x128xf32>
    %c0_110 = arith.constant 0 : index
    %c0_111 = arith.constant 0 : index
    %252 = vector.load %arg5[%c0_110, %c0_111] : memref<8x32xf32, #tpu.memory_space<vmem>>, vector<8x32xf32>
    %253 = arith.truncf %252 : vector<8x32xf32> to vector<8x32xbf16>
    %c0_112 = arith.constant 0 : index
    %c0_113 = arith.constant 0 : index
    %254 = vector.load %arg3[%c0_112, %c0_113] : memref<32x128xbf16, #tpu.memory_space<vmem>>, vector<32x128xbf16>
    %cst_114 = arith.constant dense<0.000000e+00> : vector<8x128xf32>
    %255 = tpu.matmul %253, %254, %cst_114 {dimension_numbers = #tpu.dot_dimension_numbers<[1], [0], [0], [1], [0, 0, 1, 1], [], []>} : vector<8x32xbf16>, vector<32x128xbf16>, vector<8x128xf32> -> vector<8x128xf32>
    %256 = arith.addf %251, %255 : vector<8x128xf32>
    %257 = vector.extract_strided_slice %256 {offsets = [0, 0], sizes = [8, 32], strides = [1, 1]} : vector<8x128xf32> to vector<8x32xf32>
    %258 = arith.negf %257 : vector<8x32xf32>
    %259 = math.exp %258 : vector<8x32xf32>
    %cst_115 = arith.constant 1.000000e+00 : f32
    %260 = vector.broadcast %cst_115 : f32 to vector<8x32xf32>
    %261 = arith.addf %260, %259 : vector<8x32xf32>
    %262 = arith.divf %260, %261 : vector<8x32xf32>
    %263 = vector.extract_strided_slice %256 {offsets = [0, 32], sizes = [8, 32], strides = [1, 1]} : vector<8x128xf32> to vector<8x32xf32>
    %264 = arith.negf %263 : vector<8x32xf32>
    %265 = math.exp %264 : vector<8x32xf32>
    %cst_116 = arith.constant 1.000000e+00 : f32
    %266 = vector.broadcast %cst_116 : f32 to vector<8x32xf32>
    %267 = arith.addf %266, %265 : vector<8x32xf32>
    %268 = arith.divf %266, %267 : vector<8x32xf32>
    %269 = vector.extract_strided_slice %256 {offsets = [0, 64], sizes = [8, 32], strides = [1, 1]} : vector<8x128xf32> to vector<8x32xf32>
    %270 = math.tanh %269 : vector<8x32xf32>
    %271 = vector.extract_strided_slice %256 {offsets = [0, 96], sizes = [8, 32], strides = [1, 1]} : vector<8x128xf32> to vector<8x32xf32>
    %272 = arith.negf %271 : vector<8x32xf32>
    %273 = math.exp %272 : vector<8x32xf32>
    %cst_117 = arith.constant 1.000000e+00 : f32
    %274 = vector.broadcast %cst_117 : f32 to vector<8x32xf32>
    %275 = arith.addf %274, %273 : vector<8x32xf32>
    %276 = arith.divf %274, %275 : vector<8x32xf32>
    %c0_118 = arith.constant 0 : index
    %c0_119 = arith.constant 0 : index
    %277 = vector.load %arg6[%c0_118, %c0_119] : memref<8x32xf32, #tpu.memory_space<vmem>>, vector<8x32xf32>
    %278 = arith.mulf %268, %277 : vector<8x32xf32>
    %279 = arith.mulf %262, %270 : vector<8x32xf32>
    %280 = arith.addf %278, %279 : vector<8x32xf32>
    %281 = math.tanh %280 : vector<8x32xf32>
    %282 = arith.mulf %276, %281 : vector<8x32xf32>
    %c0_120 = arith.constant 0 : index
    %c0_121 = arith.constant 0 : index
    %283 = vector.load %arg6[%c0_120, %c0_121] : memref<8x32xf32, #tpu.memory_space<vmem>>, vector<8x32xf32>
    tpu.vector_store %arg6[%c0_120, %c0_121], %280 {strides = array<i32>} : memref<8x32xf32, #tpu.memory_space<vmem>>, vector<8x32xf32>,
    %c0_122 = arith.constant 0 : index
    %c0_123 = arith.constant 0 : index
    %284 = vector.load %arg5[%c0_122, %c0_123] : memref<8x32xf32, #tpu.memory_space<vmem>>, vector<8x32xf32>
    tpu.vector_store %arg5[%c0_122, %c0_123], %282 {strides = array<i32>} : memref<8x32xf32, #tpu.memory_space<vmem>>, vector<8x32xf32>,
    %285 = arith.truncf %282 : vector<8x32xf32> to vector<8x32xbf16>
    %286 = arith.index_cast %c6_i32 : i32 to index
    %c0_124 = arith.constant 0 : index
    %c0_125 = arith.constant 0 : index
    %287 = vector.load %arg4[%286, %c0_124, %c0_125] : memref<8x8x32xbf16, #tpu.memory_space<vmem>>, vector<1x8x32xbf16>
    %288 = vector.shape_cast %287 : vector<1x8x32xbf16> to vector<8x32xbf16>
    %289 = vector.shape_cast %285 : vector<8x32xbf16> to vector<1x8x32xbf16>
    tpu.vector_store %arg4[%286, %c0_124, %c0_125], %289 {strides = array<i32>} : memref<8x8x32xbf16, #tpu.memory_space<vmem>>, vector<1x8x32xbf16>,
    %c7_i32 = arith.constant 7 : i32
    %290 = arith.index_cast %c7_i32 : i32 to index
    %c0_126 = arith.constant 0 : index
    %c0_127 = arith.constant 0 : index
    %291 = vector.load %arg2[%290, %c0_126, %c0_127] : memref<8x8x128xf32, #tpu.memory_space<vmem>>, vector<1x8x128xf32>
    %292 = vector.shape_cast %291 : vector<1x8x128xf32> to vector<8x128xf32>
    %c0_128 = arith.constant 0 : index
    %c0_129 = arith.constant 0 : index
    %293 = vector.load %arg5[%c0_128, %c0_129] : memref<8x32xf32, #tpu.memory_space<vmem>>, vector<8x32xf32>
    %294 = arith.truncf %293 : vector<8x32xf32> to vector<8x32xbf16>
    %c0_130 = arith.constant 0 : index
    %c0_131 = arith.constant 0 : index
    %295 = vector.load %arg3[%c0_130, %c0_131] : memref<32x128xbf16, #tpu.memory_space<vmem>>, vector<32x128xbf16>
    %cst_132 = arith.constant dense<0.000000e+00> : vector<8x128xf32>
    %296 = tpu.matmul %294, %295, %cst_132 {dimension_numbers = #tpu.dot_dimension_numbers<[1], [0], [0], [1], [0, 0, 1, 1], [], []>} : vector<8x32xbf16>, vector<32x128xbf16>, vector<8x128xf32> -> vector<8x128xf32>
    %297 = arith.addf %292, %296 : vector<8x128xf32>
    %298 = vector.extract_strided_slice %297 {offsets = [0, 0], sizes = [8, 32], strides = [1, 1]} : vector<8x128xf32> to vector<8x32xf32>
    %299 = arith.negf %298 : vector<8x32xf32>
    %300 = math.exp %299 : vector<8x32xf32>
    %cst_133 = arith.constant 1.000000e+00 : f32
    %301 = vector.broadcast %cst_133 : f32 to vector<8x32xf32>
    %302 = arith.addf %301, %300 : vector<8x32xf32>
    %303 = arith.divf %301, %302 : vector<8x32xf32>
    %304 = vector.extract_strided_slice %297 {offsets = [0, 32], sizes = [8, 32], strides = [1, 1]} : vector<8x128xf32> to vector<8x32xf32>
    %305 = arith.negf %304 : vector<8x32xf32>
    %306 = math.exp %305 : vector<8x32xf32>
    %cst_134 = arith.constant 1.000000e+00 : f32
    %307 = vector.broadcast %cst_134 : f32 to vector<8x32xf32>
    %308 = arith.addf %307, %306 : vector<8x32xf32>
    %309 = arith.divf %307, %308 : vector<8x32xf32>
    %310 = vector.extract_strided_slice %297 {offsets = [0, 64], sizes = [8, 32], strides = [1, 1]} : vector<8x128xf32> to vector<8x32xf32>
    %311 = math.tanh %310 : vector<8x32xf32>
    %312 = vector.extract_strided_slice %297 {offsets = [0, 96], sizes = [8, 32], strides = [1, 1]} : vector<8x128xf32> to vector<8x32xf32>
    %313 = arith.negf %312 : vector<8x32xf32>
    %314 = math.exp %313 : vector<8x32xf32>
    %cst_135 = arith.constant 1.000000e+00 : f32
    %315 = vector.broadcast %cst_135 : f32 to vector<8x32xf32>
    %316 = arith.addf %315, %314 : vector<8x32xf32>
    %317 = arith.divf %315, %316 : vector<8x32xf32>
    %c0_136 = arith.constant 0 : index
    %c0_137 = arith.constant 0 : index
    %318 = vector.load %arg6[%c0_136, %c0_137] : memref<8x32xf32, #tpu.memory_space<vmem>>, vector<8x32xf32>
    %319 = arith.mulf %309, %318 : vector<8x32xf32>
    %320 = arith.mulf %303, %311 : vector<8x32xf32>
    %321 = arith.addf %319, %320 : vector<8x32xf32>
    %322 = math.tanh %321 : vector<8x32xf32>
    %323 = arith.mulf %317, %322 : vector<8x32xf32>
    %c0_138 = arith.constant 0 : index
    %c0_139 = arith.constant 0 : index
    %324 = vector.load %arg6[%c0_138, %c0_139] : memref<8x32xf32, #tpu.memory_space<vmem>>, vector<8x32xf32>
    tpu.vector_store %arg6[%c0_138, %c0_139], %321 {strides = array<i32>} : memref<8x32xf32, #tpu.memory_space<vmem>>, vector<8x32xf32>,
    %c0_140 = arith.constant 0 : index
    %c0_141 = arith.constant 0 : index
    %325 = vector.load %arg5[%c0_140, %c0_141] : memref<8x32xf32, #tpu.memory_space<vmem>>, vector<8x32xf32>
    tpu.vector_store %arg5[%c0_140, %c0_141], %323 {strides = array<i32>} : memref<8x32xf32, #tpu.memory_space<vmem>>, vector<8x32xf32>,
    %326 = arith.truncf %323 : vector<8x32xf32> to vector<8x32xbf16>
    %327 = arith.index_cast %c7_i32 : i32 to index
    %c0_142 = arith.constant 0 : index
    %c0_143 = arith.constant 0 : index
    %328 = vector.load %arg4[%327, %c0_142, %c0_143] : memref<8x8x32xbf16, #tpu.memory_space<vmem>>, vector<1x8x32xbf16>
    %329 = vector.shape_cast %328 : vector<1x8x32xbf16> to vector<8x32xbf16>
    %330 = vector.shape_cast %326 : vector<8x32xbf16> to vector<1x8x32xbf16>
    tpu.vector_store %arg4[%327, %c0_142, %c0_143], %330 {strides = array<i32>} : memref<8x8x32xbf16, #tpu.memory_space<vmem>>, vector<1x8x32xbf16>,
    %c8_i32 = arith.constant 8 : i32
    return
  }
  func.func @transform_0(%arg0: i32, %arg1: i32) -> (i32, i32, i32) {
    %c0_i32 = arith.constant 0 : i32
    %c0_i32_0 = arith.constant 0 : i32
    return %arg1, %arg0, %c0_i32 : i32, i32, i32
  }
  func.func @transform_1(%arg0: i32, %arg1: i32) -> (i32, i32) {
    %c0_i32 = arith.constant 0 : i32
    %c0_i32_0 = arith.constant 0 : i32
    %c0_i32_1 = arith.constant 0 : i32
    return %c0_i32, %c0_i32_0 : i32, i32
  }
  func.func @transform_2(%arg0: i32, %arg1: i32) -> (i32, i32, i32) {
    %c0_i32 = arith.constant 0 : i32
    %c0_i32_0 = arith.constant 0 : i32
    return %arg1, %arg0, %c0_i32 : i32, i32, i32
  }
}

module attributes {stable_mosaic.version = 11 : i64} {
  func.func @_masked_ce_kernel(%arg0: i32, %arg1: i32, %arg2: memref<64x32xbf16, #tpu.memory_space<vmem>>, %arg3: memref<64x1xi32, #tpu.memory_space<vmem>>, %arg4: memref<64x1xf32, #tpu.memory_space<vmem>>, %arg5: memref<32x128xbf16, #tpu.memory_space<vmem>>, %arg6: memref<1x128xf32, #tpu.memory_space<vmem>>, %arg7: memref<64x1xf32, #tpu.memory_space<vmem>>, %arg8: memref<64x1xf32, #tpu.memory_space<vmem>>, %arg9: memref<64x1xf32, #tpu.memory_space<vmem>>, %arg10: memref<64x1xf32, #tpu.memory_space<vmem>>) attributes {dimension_semantics = [#tpu.dimension_semantics<parallel>, #tpu.dimension_semantics<arbitrary>], iteration_bounds = array<i64: 1, 1>, scalar_prefetch = 0 : i64, scratch_operands = 3 : i64, tpu.core_type = #tpu.core_type<tc>, window_params = [{transform_indices = @transform_0, window_bounds = array<i64: 64, 32>}, {transform_indices = @transform_1, window_bounds = array<i64: 64, 1>}, {transform_indices = @transform_2, window_bounds = array<i64: 64, 1>}, {transform_indices = @transform_3, window_bounds = array<i64: 32, 128>}, {transform_indices = @transform_4, window_bounds = array<i64: 1, 128>}, {transform_indices = @transform_5, window_bounds = array<i64: 64, 1>}]} {
    %c0_i32 = arith.constant 0 : i32
    %0 = arith.cmpi eq, %arg1, %c0_i32 : i32
    %1 = arith.extui %0 : i1 to i32
    %c0_i32_0 = arith.constant 0 : i32
    %2 = arith.cmpi ne, %1, %c0_i32_0 : i32
    scf.if %2 {
      %cst_26 = arith.constant 0xFF800000 : f32
      %42 = vector.broadcast %cst_26 : f32 to vector<64x1xf32>
      %c0_27 = arith.constant 0 : index
      %c0_28 = arith.constant 0 : index
      %43 = vector.load %arg8[%c0_27, %c0_28] : memref<64x1xf32, #tpu.memory_space<vmem>>, vector<64x1xf32>
      tpu.vector_store %arg8[%c0_27, %c0_28], %42 {strides = array<i32>} : memref<64x1xf32, #tpu.memory_space<vmem>>, vector<64x1xf32>,
      %cst_29 = arith.constant 0.000000e+00 : f32
      %44 = vector.broadcast %cst_29 : f32 to vector<64x1xf32>
      %c0_30 = arith.constant 0 : index
      %c0_31 = arith.constant 0 : index
      %45 = vector.load %arg9[%c0_30, %c0_31] : memref<64x1xf32, #tpu.memory_space<vmem>>, vector<64x1xf32>
      tpu.vector_store %arg9[%c0_30, %c0_31], %44 {strides = array<i32>} : memref<64x1xf32, #tpu.memory_space<vmem>>, vector<64x1xf32>,
      %cst_32 = arith.constant 0.000000e+00 : f32
      %46 = vector.broadcast %cst_32 : f32 to vector<64x1xf32>
      %c0_33 = arith.constant 0 : index
      %c0_34 = arith.constant 0 : index
      %47 = vector.load %arg10[%c0_33, %c0_34] : memref<64x1xf32, #tpu.memory_space<vmem>>, vector<64x1xf32>
      tpu.vector_store %arg10[%c0_33, %c0_34], %46 {strides = array<i32>} : memref<64x1xf32, #tpu.memory_space<vmem>>, vector<64x1xf32>,
    } else {
    }
    %c0 = arith.constant 0 : index
    %c0_1 = arith.constant 0 : index
    %3 = vector.load %arg2[%c0, %c0_1] : memref<64x32xbf16, #tpu.memory_space<vmem>>, vector<64x32xbf16>
    %c0_2 = arith.constant 0 : index
    %c0_3 = arith.constant 0 : index
    %4 = vector.load %arg5[%c0_2, %c0_3] : memref<32x128xbf16, #tpu.memory_space<vmem>>, vector<32x128xbf16>
    %cst = arith.constant dense<0.000000e+00> : vector<64x128xf32>
    %5 = tpu.matmul %3, %4, %cst {dimension_numbers = #tpu.dot_dimension_numbers<[1], [0], [0], [1], [0, 0, 1, 1], [], []>} : vector<64x32xbf16>, vector<32x128xbf16>, vector<64x128xf32> -> vector<64x128xf32>
    %c0_4 = arith.constant 0 : index
    %c0_5 = arith.constant 0 : index
    %6 = vector.load %arg6[%c0_4, %c0_5] : memref<1x128xf32, #tpu.memory_space<vmem>>, vector<1x128xf32>
    %7 = vector.broadcast %6 : vector<1x128xf32> to vector<64x128xf32>
    %8 = arith.addf %5, %7 : vector<64x128xf32>
    %c0_6 = arith.constant 0 : index
    %c0_7 = arith.constant 0 : index
    %9 = vector.load %arg8[%c0_6, %c0_7] : memref<64x1xf32, #tpu.memory_space<vmem>>, vector<64x1xf32>
    %cst_8 = arith.constant dense<0xFF800000> : vector<64xf32>
    %10 = vector.multi_reduction <maximumf>, %8, %cst_8 [1] : vector<64x128xf32> to vector<64xf32>
    %11 = vector.shape_cast %10 : vector<64xf32> to vector<64x1xf32>
    %12 = arith.maximumf %9, %11 : vector<64x1xf32>
    %13 = arith.subf %9, %12 : vector<64x1xf32>
    %14 = math.exp %13 : vector<64x1xf32>
    %c0_9 = arith.constant 0 : index
    %c0_10 = arith.constant 0 : index
    %15 = vector.load %arg9[%c0_9, %c0_10] : memref<64x1xf32, #tpu.memory_space<vmem>>, vector<64x1xf32>
    %16 = arith.mulf %14, %15 : vector<64x1xf32>
    %17 = vector.broadcast %12 : vector<64x1xf32> to vector<64x128xf32>
    %18 = arith.subf %8, %17 : vector<64x128xf32>
    %19 = math.exp %18 : vector<64x128xf32>
    %cst_11 = arith.constant dense<0.000000e+00> : vector<64xf32>
    %20 = vector.multi_reduction <add>, %19, %cst_11 [1] : vector<64x128xf32> to vector<64xf32>
    %21 = vector.shape_cast %20 : vector<64xf32> to vector<64x1xf32>
    %22 = arith.addf %16, %21 : vector<64x1xf32>
    %c0_12 = arith.constant 0 : index
    %c0_13 = arith.constant 0 : index
    %23 = vector.load %arg9[%c0_12, %c0_13] : memref<64x1xf32, #tpu.memory_space<vmem>>, vector<64x1xf32>
    tpu.vector_store %arg9[%c0_12, %c0_13], %22 {strides = array<i32>} : memref<64x1xf32, #tpu.memory_space<vmem>>, vector<64x1xf32>,
    %c0_14 = arith.constant 0 : index
    %c0_15 = arith.constant 0 : index
    %24 = vector.load %arg8[%c0_14, %c0_15] : memref<64x1xf32, #tpu.memory_space<vmem>>, vector<64x1xf32>
    tpu.vector_store %arg8[%c0_14, %c0_15], %12 {strides = array<i32>} : memref<64x1xf32, #tpu.memory_space<vmem>>, vector<64x1xf32>,
    %25 = tpu.iota {dimensions = array<i32: 1>} : vector<64x128xi32>
    %c128_i32 = arith.constant 128 : i32
    %26 = arith.muli %arg1, %c128_i32 : i32
    %27 = vector.broadcast %26 : i32 to vector<64x128xi32>
    %28 = arith.addi %25, %27 : vector<64x128xi32>
    %c0_16 = arith.constant 0 : index
    %c0_17 = arith.constant 0 : index
    %29 = vector.load %arg10[%c0_16, %c0_17] : memref<64x1xf32, #tpu.memory_space<vmem>>, vector<64x1xf32>
    %c0_18 = arith.constant 0 : index
    %c0_19 = arith.constant 0 : index
    %30 = vector.load %arg3[%c0_18, %c0_19] : memref<64x1xi32, #tpu.memory_space<vmem>>, vector<64x1xi32>
    %31 = vector.broadcast %30 : vector<64x1xi32> to vector<64x128xi32>
    %32 = arith.cmpi eq, %28, %31 : vector<64x128xi32>
    %cst_20 = arith.constant 0.000000e+00 : f32
    %33 = vector.broadcast %cst_20 : f32 to vector<64x128xf32>
    %34 = arith.select %32, %8, %33 : vector<64x128xi1>, vector<64x128xf32>
    %cst_21 = arith.constant dense<0.000000e+00> : vector<64xf32>
    %35 = vector.multi_reduction <add>, %34, %cst_21 [1] : vector<64x128xf32> to vector<64xf32>
    %36 = vector.shape_cast %35 : vector<64xf32> to vector<64x1xf32>
    %37 = arith.addf %29, %36 : vector<64x1xf32>
    %c0_22 = arith.constant 0 : index
    %c0_23 = arith.constant 0 : index
    %38 = vector.load %arg10[%c0_22, %c0_23] : memref<64x1xf32, #tpu.memory_space<vmem>>, vector<64x1xf32>
    tpu.vector_store %arg10[%c0_22, %c0_23], %37 {strides = array<i32>} : memref<64x1xf32, #tpu.memory_space<vmem>>, vector<64x1xf32>,
    %c0_i32_24 = arith.constant 0 : i32
    %39 = arith.cmpi eq, %arg1, %c0_i32_24 : i32
    %40 = arith.extui %39 : i1 to i32
    %c0_i32_25 = arith.constant 0 : i32
    %41 = arith.cmpi ne, %40, %c0_i32_25 : i32
    scf.if %41 {
      %c0_26 = arith.constant 0 : index
      %c0_27 = arith.constant 0 : index
      %42 = vector.load %arg8[%c0_26, %c0_27] : memref<64x1xf32, #tpu.memory_space<vmem>>, vector<64x1xf32>
      %c0_28 = arith.constant 0 : index
      %c0_29 = arith.constant 0 : index
      %43 = vector.load %arg9[%c0_28, %c0_29] : memref<64x1xf32, #tpu.memory_space<vmem>>, vector<64x1xf32>
      %44 = math.log %43 : vector<64x1xf32>
      %45 = arith.addf %42, %44 : vector<64x1xf32>
      %c0_30 = arith.constant 0 : index
      %c0_31 = arith.constant 0 : index
      %46 = vector.load %arg10[%c0_30, %c0_31] : memref<64x1xf32, #tpu.memory_space<vmem>>, vector<64x1xf32>
      %47 = arith.subf %45, %46 : vector<64x1xf32>
      %c0_32 = arith.constant 0 : index
      %c0_33 = arith.constant 0 : index
      %48 = vector.load %arg4[%c0_32, %c0_33] : memref<64x1xf32, #tpu.memory_space<vmem>>, vector<64x1xf32>
      %49 = arith.mulf %47, %48 : vector<64x1xf32>
      %c0_34 = arith.constant 0 : index
      %c0_35 = arith.constant 0 : index
      %50 = vector.load %arg7[%c0_34, %c0_35] : memref<64x1xf32, #tpu.memory_space<vmem>>, vector<64x1xf32>
      tpu.vector_store %arg7[%c0_34, %c0_35], %49 {strides = array<i32>} : memref<64x1xf32, #tpu.memory_space<vmem>>, vector<64x1xf32>,
    } else {
    }
    return
  }
  func.func @transform_0(%arg0: i32, %arg1: i32) -> (i32, i32) {
    %c0_i32 = arith.constant 0 : i32
    %c0_i32_0 = arith.constant 0 : i32
    return %arg0, %c0_i32 : i32, i32
  }
  func.func @transform_1(%arg0: i32, %arg1: i32) -> (i32, i32) {
    %c0_i32 = arith.constant 0 : i32
    %c0_i32_0 = arith.constant 0 : i32
    return %arg0, %c0_i32 : i32, i32
  }
  func.func @transform_2(%arg0: i32, %arg1: i32) -> (i32, i32) {
    %c0_i32 = arith.constant 0 : i32
    %c0_i32_0 = arith.constant 0 : i32
    return %arg0, %c0_i32 : i32, i32
  }
  func.func @transform_3(%arg0: i32, %arg1: i32) -> (i32, i32) {
    %c0_i32 = arith.constant 0 : i32
    %c0_i32_0 = arith.constant 0 : i32
    return %c0_i32, %arg1 : i32, i32
  }
  func.func @transform_4(%arg0: i32, %arg1: i32) -> (i32, i32) {
    %c0_i32 = arith.constant 0 : i32
    %c0_i32_0 = arith.constant 0 : i32
    return %c0_i32, %arg1 : i32, i32
  }
  func.func @transform_5(%arg0: i32, %arg1: i32) -> (i32, i32) {
    %c0_i32 = arith.constant 0 : i32
    %c0_i32_0 = arith.constant 0 : i32
    return %arg0, %c0_i32 : i32, i32
  }
}

</mosaic_0001>

<bundles_post_ra>
// kernel: rnn_model_forward.5
= control target key start
LH: loop header
LB: loop body
LE: loop exit
PB: predicated region body
PF: predicated region fallthrough
CT: control target
= control target key end

     0   :  { %vm66_vm0 = vcmask 261120   ;;  %s260_s1 = inlined_call_operand.vmem [shape: bf16[32,128], index: 1, kind: input, shape index: {}]   ;;  %s261_s0 = inlined_call_operand.vmem [shape: bf16[64,32], index: 0, kind: input, shape index: {}]   ;;  %s262_s2 = inlined_call_operand.vmem [shape: f32[1,128], index: 2, kind: input, shape index: {}]   ;;  %s263_s3 = inlined_call_operand.vmem [shape: f32[64,128], index: 3, kind: output, shape index: {}]  }
   0x1   :  { %v189_v0 = vld [vmem:[%s260_s1 + $0x8] sm:$0xff]   ;;  %v190_v1 = vld [vmem:[%s260_s1] sm:$0xff]   ;;  %v192_v3 = vld [vmem:[%s261_s0 + $0x10] sm:$0xff]  }
   0x2   :  { %173 = vmatprep.subr.bf16.mxu0 %v189_v0  ;;  %185 = vmatprep.subr.bf16.mxu1 %v189_v0  ;;  %v191_v2 = vld [vmem:[%s261_s0] sm:$0xff]   ;;  %v193_v4 = vld [vmem:[%s261_s0 + $0x8] sm:$0xff]   ;;  %v194_v5 = vld [vmem:[%s261_s0 + $0x18] sm:$0xff]  }
   0x3   :  { %174 = vmatpush3.bf16.msra.mxu0 %v189_v0  ;;  %187 = vmatpush3.bf16.msra.mxu1 %v189_v0  ;;  %v156_v6 = vld [vmem:[%s262_s2] ss:$0 sm:$0xff] }
   0x4   :  { %175 = vmatprep.subr.bf16.mxu0 %v190_v1  ;;  %186 = vmatprep.subr.bf16.mxu1 %v190_v1 }
   0x5   :  { %177 = vmatprep.mubr.msk.bf16.mxu0 %vm66_vm0, %v191_v2  ;;  %181 = vmatprep.mubr.msk.bf16.mxu1 %vm66_vm0, %v192_v3 }
   0x7   :  { %176 = vmatpush3.bf16.msra.mxu0 %v190_v1  ;;  %188 = vmatpush3.bf16.msra.mxu1 %v190_v1 }
   0xa   :  { %178 = vmatmul.mubr.msk.bf16.vlgmr.msra.gmra.mxu0 %vm66_vm0, %v193_v4  ;;  %182 = vmatmul.mubr.msk.bf16.vlgmr.msra.gmra.mxu1 %vm66_vm0, %v194_v5 }
  0xca   :  { %v179_v7 = vpop.f32.mrf.mxu0  ;;  %v183_v8 = vpop.f32.mrf.mxu1 }
  0xcb   :  { %v122_v9 = vadd.f32 %v179_v7, %v156_v6  ;;  %v138_v10 = vadd.f32 %v183_v8, %v156_v6 }
  0xcc   :  { %v113_v11 = vpop.f32.mrf.mxu0  ;;  %v129_v12 = vpop.f32.mrf.mxu1 }
  0xcd   :  { %146 = vst [vmem:[%s263_s3 + $0x10] sm:$0xff] %v122_v9  ;;  %150 = vst [vmem:[%s263_s3 + $0x30] sm:$0xff] %v138_v10  ;;  %v114_v13 = vadd.f32 %v156_v6, %v113_v11  ;;  %v130_v14 = vadd.f32 %v156_v6, %v129_v12 }
  0xce   :  { %v180_v15 = vpop.f32.mrf.mxu0  ;;  %v184_v16 = vpop.f32.mrf.mxu1 }
  0xcf   :  { %144 = vst [vmem:[%s263_s3] sm:$0xff] %v114_v13  ;;  %148 = vst [vmem:[%s263_s3 + $0x20] sm:$0xff] %v130_v14  ;;  %v125_v17 = vadd.f32 %v180_v15, %v156_v6  ;;  %v141_v18 = vadd.f32 %v184_v16, %v156_v6 }
  0xd0   :  { %v116_v19 = vpop.f32.mrf.mxu0  ;;  %v132_v20 = vpop.f32.mrf.mxu1 }
  0xd1   :  { %147 = vst [vmem:[%s263_s3 + $0x18] sm:$0xff] %v125_v17  ;;  %151 = vst [vmem:[%s263_s3 + $0x38] sm:$0xff] %v141_v18  ;;  %v117_v21 = vadd.f32 %v156_v6, %v116_v19  ;;  %v133_v22 = vadd.f32 %v156_v6, %v132_v20 }
  0xd3   :  { %145 = vst [vmem:[%s263_s3 + $0x8] sm:$0xff] %v117_v21  ;;  %149 = vst [vmem:[%s263_s3 + $0x28] sm:$0xff] %v133_v22 }

// kernel: rnn_model_forward.6
= control target key start
LH: loop header
LB: loop body
LE: loop exit
PB: predicated region body
PF: predicated region fallthrough
CT: control target
= control target key end

     0   :  { %vm16_vm0 = vcmask 261120   ;;  %v1154_v0 = vmov 0.0   ;;  %vm1155_vm1 = vmmov 0   ;;  %s1156_s15 = smov 64   ;;  %s1157_s16 = smov 32   ;;  %vm129_vm2 = vcmask 257024   ;;  %s1424_s1 = inlined_call_operand.vmem [shape: bf16[32,128], index: 1, kind: input, shape index: {}]   ;;  %s1425_s0 = inlined_call_operand.vmem [shape: f32[8,8,128], index: 0, kind: input, shape index: {}]   ;;  %s1426_s2 = inlined_call_operand.vmem [shape: bf16[8,8,32], index: 2, kind: output, shape index: {}]  }
   0x1   :  { %1005 = vmatprep.subr.bf16.mxu0 %v1154_v0  ;;  %v1074_v1 = vld [vmem:[%s1424_s1 + $0x8] sm:$0xff]   ;;  %1009 = vmatprep.mubr.msk.bf16.mxu0 %vm1155_vm1, %v1154_v0  ;;  %17 = vst.msk [vmem:[#allocation2] sm:$0xff] %vm16_vm0, %v1154_v0  ;;  %18 = vst.msk [vmem:[#allocation3] sm:$0xff] %vm16_vm0, %v1154_v0  ;;  %v1075_v2 = vld [vmem:[%s1424_s1] sm:$0xff]   ;;  %s1158_s17 = smov 96  }
   0x2   :  { %1013 = vmatprep.subr.bf16.mxu1 %v1154_v0  ;;  %1017 = vmatprep.mubr.msk.bf16.mxu1 %vm1155_vm1, %v1154_v0  ;;  %v19_v5 = vld [vmem:[%s1425_s0] sm:$0xff]  ;;  %v1076_v24 = vld [vmem:[%s1424_s1 + $0x8] sm:$0xff]   ;;  %v931_v60 = vld [vmem:[%s1425_s0 + $0x10] sm:$0xff] }
   0x3   :  { %1006 = vmatpush3.bf16.msra.mxu0 %v1074_v1  ;;  %1014 = vmatpush3.bf16.msra.mxu1 %v1076_v24  ;;  %v1077_v25 = vld [vmem:[%s1424_s1] sm:$0xff]   ;;  %v924_v33 = vld [vmem:[%s1425_s0 + $0x8] sm:$0xff]  ;;  %v938_v24 = vld [vmem:[%s1425_s0 + $0x18] sm:$0xff] }
   0x4   :  { %1007 = vmatprep.subr.bf16.mxu0 %v1154_v0  ;;  %1015 = vmatprep.subr.bf16.mxu1 %v1154_v0  ;;  %v1078_v51 = vld [vmem:[%s1424_s1 + $0x8] sm:$0xff]   ;;  %v1079_v52 = vld [vmem:[%s1424_s1] sm:$0xff]  }
   0x7   :  { %1008 = vmatpush3.bf16.msra.mxu0 %v1075_v2  ;;  %1016 = vmatpush3.bf16.msra.mxu1 %v1077_v25 }
   0x8   :  { %v20_v3 = vld [vmem:[#allocation2] sm:$0xff]  ;;  %1021 = vmatprep.subr.bf16.mxu0 %v1154_v0  ;;  %v90_v12 = vld [vmem:[#allocation3] sm:$0xff]  ;;  %1029 = vmatprep.subr.bf16.mxu1 %v1154_v0 }
   0x9   :  { %v21_v4 = vpack.c.bf16 %v20_v3, %v20_v3 }
   0xb   :  { %1010 = vmatmul.mubr.msk.bf16.vlgmr.msra.gmra.mxu0 %vm16_vm0, %v21_v4 }
   0xc   :  { %1025 = vmatprep.mubr.msk.bf16.mxu0 %vm1155_vm1, %v1154_v0  ;;  %1022 = vmatpush3.bf16.msra.mxu0 %v1078_v51 }
   0xd   :  { %1023 = vmatprep.subr.bf16.mxu0 %v1154_v0 }
  0x10   :  { %1024 = vmatpush3.bf16.msra.mxu0 %v1079_v52  ;;  %v945_v52 = vld [vmem:[%s1425_s0 + $0x20] sm:$0xff] }
  0x11   :  { %1037 = vmatprep.subr.bf16.mxu0 %v1154_v0 }
  0xcb   :  { %v76_v6 = vpop.f32.mrf.mxu0 }
  0xcc   :  { %v82_v7 = vadd.f32 %v76_v6, %v19_v5 }
  0xcd   :  { %v1011_v8 = vpop.f32.mrf.mxu0 }
  0xce   :  { %1090 = vtanh.f32 %v82_v7  ;;  %v922_v13 = vmul.f32 -1.442695, %v82_v7 }
  0xcf   :  { %v79_v9 = vpop.f32.mrf.mxu0 }
  0xd0   :  { %1092 = vpow2.f32 %v922_v13 }
  0xd1   :  { %v1012_v10 = vpop.f32.mrf.mxu0 }
  0xdb   :  { %v1091_v11 = vpop.eup %1090 }
  0xdc   :  { %97 = vrot.lane.b32.xlu0 %v1091_v11, %s1156_s15 }
  0xdd   :  { %v1093_v14 = vpop.eup %1092 }
  0xde   :  { %v86_v15 = vadd.f32 1.0, %v1093_v14 }
  0xe0   :  { %92 = vrot.lane.b32.xlu0 %v90_v12, %s1157_s16  ;;  %1094 = vrcp.f32 %v86_v15  ;;  %v1080_v15 = vld [vmem:[%s1424_s1 + $0x8] sm:$0xff]  }
  0xed   :  { %v1095_v16 = vpop.eup %1094 }
 0x14e   :  { %v98_v17 = vpop.permute.xlu0 %97 }
 0x14f   :  { %v100_v18 = vmul.f32 %v1095_v16, %v98_v17 }
 0x151   :  { %102 = vrot.lane.b32.xlu1 %v100_v18, %s1157_s16 }
 0x152   :  { %v93_v19 = vpop.permute.xlu0 %92 }
 0x153   :  { %v95_v20 = vmul.f32 %v1095_v16, %v93_v19 }
 0x1c3   :  { %v103_v21 = vpop.permute.xlu1 %102 }
 0x1c4   :  { %v105_v22 = vadd.f32 %v103_v21, %v95_v20 }
 0x1c6   :  { %1096 = vtanh.f32 %v105_v22 }
 0x1d3   :  { %v1097_v23 = vpop.eup %1096 }
 0x1d4   :  { %108 = vrot.lane.b32.xlu1 %v1097_v23, %s1156_s15 }
 0x1d8   :  { %113 = vrot.lane.b32.xlu1 %v105_v22, %s1158_s17 }
 0x246   :  { %v109_v26 = vpop.permute.xlu1 %108 }
 0x247   :  { %v1211_v27 = vmul.f32 %v1095_v16, %v109_v26  ;;  %v1081_v16 = vld [vmem:[%s1424_s1] sm:$0xff]  }
 0x249   :  { %118 = vrot.lane.b32.xlu0 %v1211_v27, %s1157_s16 }
 0x24a   :  { %v114_v28 = vpop.permute.xlu1 %113 }
 0x24b   :  { %116 = vst.msk [vmem:[#allocation3] sm:$0xff] %vm16_vm0, %v114_v28 }
 0x252   :  { %v202_v29 = vld [vmem:[#allocation3] sm:$0xff] }
 0x253   :  { %204 = vrot.lane.b32.xlu1 %v202_v29, %s1157_s16 }
 0x2bb   :  { %v119_v30 = vpop.permute.xlu0 %118 }
 0x2bc   :  { %121 = vst.msk [vmem:[#allocation2] sm:$0xff] %vm16_vm0, %v119_v30 }
 0x2c3   :  { %v133_v31 = vld [vmem:[#allocation2] sm:$0xff] }
 0x2c4   :  { %v134_v32 = vpack.c.bf16 %v133_v31, %v133_v31 }
 0x2c5   :  { %v205_v46 = vpop.permute.xlu1 %204 }
 0x2c6   :  { %1018 = vmatmul.mubr.msk.bf16.vlgmr.msra.gmra.mxu1 %vm16_vm0, %v134_v32 }
 0x2c7   :  { %1033 = vmatprep.mubr.msk.bf16.mxu1 %vm1155_vm1, %v1154_v0  ;;  %1030 = vmatpush3.bf16.msra.mxu1 %v1080_v15 }
 0x2c8   :  { %1031 = vmatprep.subr.bf16.mxu1 %v1154_v0 }
 0x2cb   :  { %1032 = vmatpush3.bf16.msra.mxu1 %v1081_v16 }
 0x2cc   :  { %1045 = vmatprep.subr.bf16.mxu1 %v1154_v0 }
 0x386   :  { %v188_v34 = vpop.f32.mrf.mxu1 }
 0x387   :  { %v194_v35 = vadd.f32 %v924_v33, %v188_v34 }
 0x388   :  { %v1019_v36 = vpop.f32.mrf.mxu1 }
 0x389   :  { %1098 = vtanh.f32 %v194_v35  ;;  %v928_v40 = vmul.f32 -1.442695, %v194_v35 }
 0x38a   :  { %v191_v37 = vpop.f32.mrf.mxu1 }
 0x38b   :  { %1100 = vpow2.f32 %v928_v40 }
 0x38c   :  { %v1020_v38 = vpop.f32.mrf.mxu1 }
 0x396   :  { %v1099_v39 = vpop.eup %1098 }
 0x397   :  { %209 = vrot.lane.b32.xlu0 %v1099_v39, %s1156_s15 }
 0x398   :  { %v1101_v41 = vpop.eup %1100 }
 0x399   :  { %v198_v42 = vadd.f32 1.0, %v1101_v41 }
 0x39b   :  { %1102 = vrcp.f32 %v198_v42 }
 0x3a8   :  { %v1103_v43 = vpop.eup %1102 }
 0x3a9   :  { %v207_v47 = vmul.f32 %v1103_v43, %v205_v46 }
 0x409   :  { %v210_v44 = vpop.permute.xlu0 %209 }
 0x40a   :  { %v212_v45 = vmul.f32 %v1103_v43, %v210_v44  ;;  %v1083_v44 = vld [vmem:[%s1424_s1] sm:$0xff]  }
 0x40c   :  { %214 = vrot.lane.b32.xlu0 %v212_v45, %s1157_s16 }
 0x47e   :  { %v215_v48 = vpop.permute.xlu0 %214 }
 0x47f   :  { %v217_v49 = vadd.f32 %v215_v48, %v207_v47 }
 0x481   :  { %1104 = vtanh.f32 %v217_v49 }
 0x48e   :  { %v1105_v50 = vpop.eup %1104 }
 0x48f   :  { %220 = vrot.lane.b32.xlu1 %v1105_v50, %s1156_s15 }
 0x493   :  { %225 = vrot.lane.b32.xlu1 %v217_v49, %s1158_s17 }
 0x501   :  { %v221_v53 = vpop.permute.xlu1 %220 }
 0x502   :  { %v1236_v54 = vmul.f32 %v1103_v43, %v221_v53  ;;  %v1082_v43 = vld [vmem:[%s1424_s1 + $0x8] sm:$0xff]  }
 0x504   :  { %230 = vrot.lane.b32.xlu0 %v1236_v54, %s1157_s16 }
 0x505   :  { %v226_v55 = vpop.permute.xlu1 %225 }
 0x506   :  { %228 = vst.msk [vmem:[#allocation3] sm:$0xff] %vm16_vm0, %v226_v55 }
 0x50d   :  { %v314_v56 = vld [vmem:[#allocation3] sm:$0xff] }
 0x50e   :  { %316 = vrot.lane.b32.xlu1 %v314_v56, %s1157_s16 }
 0x576   :  { %v231_v57 = vpop.permute.xlu0 %230 }
 0x577   :  { %233 = vst.msk [vmem:[#allocation2] sm:$0xff] %vm16_vm0, %v231_v57 }
 0x57e   :  { %v245_v58 = vld [vmem:[#allocation2] sm:$0xff] }
 0x57f   :  { %v246_v59 = vpack.c.bf16 %v245_v58, %v245_v58 }
 0x580   :  { %v317_v10 = vpop.permute.xlu1 %316 }
 0x581   :  { %1026 = vmatmul.mubr.msk.bf16.vlgmr.msra.gmra.mxu0 %vm16_vm0, %v246_v59 }
 0x582   :  { %1041 = vmatprep.mubr.msk.bf16.mxu0 %vm1155_vm1, %v1154_v0  ;;  %1038 = vmatpush3.bf16.msra.mxu0 %v1082_v43 }
 0x583   :  { %1039 = vmatprep.subr.bf16.mxu0 %v1154_v0 }
 0x586   :  { %1040 = vmatpush3.bf16.msra.mxu0 %v1083_v44 }
 0x587   :  { %1053 = vmatprep.subr.bf16.mxu0 %v1154_v0 }
 0x641   :  { %v300_v61 = vpop.f32.mrf.mxu0 }
 0x642   :  { %v306_v62 = vadd.f32 %v931_v60, %v300_v61 }
 0x643   :  { %v1027_v63 = vpop.f32.mrf.mxu0 }
 0x644   :  { %1106 = vtanh.f32 %v306_v62  ;;  %v935_v4 = vmul.f32 -1.442695, %v306_v62 }
 0x645   :  { %v303_v1 = vpop.f32.mrf.mxu0 }
 0x646   :  { %1108 = vpow2.f32 %v935_v4 }
 0x647   :  { %v1028_v2 = vpop.f32.mrf.mxu0 }
 0x651   :  { %v1107_v3 = vpop.eup %1106 }
 0x652   :  { %321 = vrot.lane.b32.xlu0 %v1107_v3, %s1156_s15 }
 0x653   :  { %v1109_v5 = vpop.eup %1108 }
 0x654   :  { %v310_v6 = vadd.f32 1.0, %v1109_v5 }
 0x656   :  { %1110 = vrcp.f32 %v310_v6 }
 0x663   :  { %v1111_v7 = vpop.eup %1110 }
 0x664   :  { %v319_v11 = vmul.f32 %v1111_v7, %v317_v10 }
 0x6c4   :  { %v322_v8 = vpop.permute.xlu0 %321 }
 0x6c5   :  { %v324_v9 = vmul.f32 %v1111_v7, %v322_v8  ;;  %v1084_v8 = vld [vmem:[%s1424_s1 + $0x8] sm:$0xff]  }
 0x6c7   :  { %326 = vrot.lane.b32.xlu0 %v324_v9, %s1157_s16  ;;  %v1085_v9 = vld [vmem:[%s1424_s1] sm:$0xff]  }
 0x739   :  { %v327_v12 = vpop.permute.xlu0 %326 }
 0x73a   :  { %v329_v13 = vadd.f32 %v327_v12, %v319_v11 }
 0x73c   :  { %1112 = vtanh.f32 %v329_v13 }
 0x749   :  { %v1113_v14 = vpop.eup %1112 }
 0x74a   :  { %332 = vrot.lane.b32.xlu1 %v1113_v14, %s1156_s15 }
 0x74e   :  { %337 = vrot.lane.b32.xlu1 %v329_v13, %s1158_s17 }
 0x7bc   :  { %v333_v17 = vpop.permute.xlu1 %332 }
 0x7bd   :  { %v1261_v18 = vmul.f32 %v1111_v7, %v333_v17  ;;  %v952_v17 = vld [vmem:[%s1425_s0 + $0x28] sm:$0xff] }
 0x7bf   :  { %342 = vrot.lane.b32.xlu0 %v1261_v18, %s1157_s16 }
 0x7c0   :  { %v338_v19 = vpop.permute.xlu1 %337 }
 0x7c1   :  { %340 = vst.msk [vmem:[#allocation3] sm:$0xff] %vm16_vm0, %v338_v19 }
 0x7c8   :  { %v426_v20 = vld [vmem:[#allocation3] sm:$0xff] }
 0x7c9   :  { %428 = vrot.lane.b32.xlu1 %v426_v20, %s1157_s16 }
 0x831   :  { %v343_v21 = vpop.permute.xlu0 %342 }
 0x832   :  { %345 = vst.msk [vmem:[#allocation2] sm:$0xff] %vm16_vm0, %v343_v21 }
 0x839   :  { %v357_v22 = vld [vmem:[#allocation2] sm:$0xff] }
 0x83a   :  { %v358_v23 = vpack.c.bf16 %v357_v22, %v357_v22 }
 0x83b   :  { %v429_v38 = vpop.permute.xlu1 %428 }
 0x83c   :  { %1034 = vmatmul.mubr.msk.bf16.vlgmr.msra.gmra.mxu1 %vm16_vm0, %v358_v23 }
 0x83d   :  { %1049 = vmatprep.mubr.msk.bf16.mxu1 %vm1155_vm1, %v1154_v0  ;;  %1046 = vmatpush3.bf16.msra.mxu1 %v1084_v8 }
 0x83e   :  { %1047 = vmatprep.subr.bf16.mxu1 %v1154_v0 }
 0x841   :  { %1048 = vmatpush3.bf16.msra.mxu1 %v1085_v9 }
 0x842   :  { %1061 = vmatprep.subr.bf16.mxu1 %v1154_v0 }
 0x8fc   :  { %v412_v25 = vpop.f32.mrf.mxu1 }
 0x8fd   :  { %v418_v26 = vadd.f32 %v938_v24, %v412_v25 }
 0x8fe   :  { %v1035_v28 = vpop.f32.mrf.mxu1 }
 0x8ff   :  { %1114 = vtanh.f32 %v418_v26  ;;  %v942_v32 = vmul.f32 -1.442695, %v418_v26 }
 0x900   :  { %v415_v29 = vpop.f32.mrf.mxu1 }
 0x901   :  { %1116 = vpow2.f32 %v942_v32 }
 0x902   :  { %v1036_v30 = vpop.f32.mrf.mxu1 }
 0x90c   :  { %v1115_v31 = vpop.eup %1114 }
 0x90d   :  { %433 = vrot.lane.b32.xlu0 %v1115_v31, %s1156_s15 }
 0x90e   :  { %v1117_v33 = vpop.eup %1116 }
 0x90f   :  { %v422_v34 = vadd.f32 1.0, %v1117_v33 }
 0x911   :  { %1118 = vrcp.f32 %v422_v34 }
 0x91e   :  { %v1119_v35 = vpop.eup %1118 }
 0x91f   :  { %v431_v39 = vmul.f32 %v1119_v35, %v429_v38  ;;  %v1087_v38 = vld [vmem:[%s1424_s1] sm:$0xff]  }
 0x97f   :  { %v434_v36 = vpop.permute.xlu0 %433 }
 0x980   :  { %v436_v37 = vmul.f32 %v1119_v35, %v434_v36 }
 0x982   :  { %438 = vrot.lane.b32.xlu0 %v436_v37, %s1157_s16  ;;  %v1086_v37 = vld [vmem:[%s1424_s1 + $0x8] sm:$0xff]  }
 0x9f4   :  { %v439_v40 = vpop.permute.xlu0 %438 }
 0x9f5   :  { %v441_v41 = vadd.f32 %v439_v40, %v431_v39 }
 0x9f7   :  { %1120 = vtanh.f32 %v441_v41 }
 0xa04   :  { %v1121_v42 = vpop.eup %1120 }
 0xa05   :  { %444 = vrot.lane.b32.xlu1 %v1121_v42, %s1156_s15 }
 0xa09   :  { %449 = vrot.lane.b32.xlu1 %v441_v41, %s1158_s17 }
 0xa77   :  { %v445_v45 = vpop.permute.xlu1 %444 }
 0xa78   :  { %v1286_v46 = vmul.f32 %v1119_v35, %v445_v45 }
 0xa7a   :  { %454 = vrot.lane.b32.xlu0 %v1286_v46, %s1157_s16 }
 0xa7b   :  { %v450_v47 = vpop.permute.xlu1 %449 }
 0xa7c   :  { %452 = vst.msk [vmem:[#allocation3] sm:$0xff] %vm16_vm0, %v450_v47  ;;  %v959_v47 = vld [vmem:[%s1425_s0 + $0x30] sm:$0xff] }
 0xa83   :  { %v538_v48 = vld [vmem:[#allocation3] sm:$0xff] }
 0xa84   :  { %540 = vrot.lane.b32.xlu1 %v538_v48, %s1157_s16 }
 0xaec   :  { %v455_v49 = vpop.permute.xlu0 %454 }
 0xaed   :  { %457 = vst.msk [vmem:[#allocation2] sm:$0xff] %vm16_vm0, %v455_v49 }
 0xaf4   :  { %v469_v50 = vld [vmem:[#allocation2] sm:$0xff] }
 0xaf5   :  { %v470_v51 = vpack.c.bf16 %v469_v50, %v469_v50 }
 0xaf6   :  { %v541_v3 = vpop.permute.xlu1 %540 }
 0xaf7   :  { %1042 = vmatmul.mubr.msk.bf16.vlgmr.msra.gmra.mxu0 %vm16_vm0, %v470_v51 }
 0xaf8   :  { %1057 = vmatprep.mubr.msk.bf16.mxu0 %vm1155_vm1, %v1154_v0  ;;  %1054 = vmatpush3.bf16.msra.mxu0 %v1086_v37  ;;  %v974_v37 = vpack.c.bf16 %v1236_v54, %v1236_v54 }
 0xaf9   :  { %1055 = vmatprep.subr.bf16.mxu0 %v1154_v0 }
 0xafc   :  { %1056 = vmatpush3.bf16.msra.mxu0 %v1087_v38  ;;  %v976_v38 = vpack.c.bf16 %v1286_v46, %v1286_v46 }
 0xbb7   :  { %v524_v53 = vpop.f32.mrf.mxu0 }
 0xbb8   :  { %v530_v55 = vadd.f32 %v945_v52, %v524_v53 }
 0xbb9   :  { %v1043_v56 = vpop.f32.mrf.mxu0 }
 0xbba   :  { %1122 = vtanh.f32 %v530_v55  ;;  %v949_v60 = vmul.f32 -1.442695, %v530_v55 }
 0xbbb   :  { %v527_v57 = vpop.f32.mrf.mxu0 }
 0xbbc   :  { %1124 = vpow2.f32 %v949_v60 }
 0xbbd   :  { %v1044_v58 = vpop.f32.mrf.mxu0 }
 0xbc7   :  { %v1123_v59 = vpop.eup %1122 }
 0xbc8   :  { %545 = vrot.lane.b32.xlu0 %v1123_v59, %s1156_s15 }
 0xbc9   :  { %v1125_v61 = vpop.eup %1124 }
 0xbca   :  { %v534_v62 = vadd.f32 1.0, %v1125_v61 }
 0xbcc   :  { %1126 = vrcp.f32 %v534_v62 }
 0xbd9   :  { %v1127_v63 = vpop.eup %1126 }
 0xbda   :  { %v543_v4 = vmul.f32 %v1127_v63, %v541_v3  ;;  %v1088_v3 = vld [vmem:[%s1424_s1 + $0x8] sm:$0xff]  }
 0xc3a   :  { %v546_v1 = vpop.permute.xlu0 %545 }
 0xc3b   :  { %v548_v2 = vmul.f32 %v1127_v63, %v546_v1 }
 0xc3d   :  { %550 = vrot.lane.b32.xlu0 %v548_v2, %s1157_s16 }
 0xcaf   :  { %v551_v5 = vpop.permute.xlu0 %550 }
 0xcb0   :  { %v553_v6 = vadd.f32 %v551_v5, %v543_v4  ;;  %v1089_v4 = vld [vmem:[%s1424_s1] sm:$0xff]  }
 0xcb2   :  { %1128 = vtanh.f32 %v553_v6 }
 0xcbf   :  { %v1129_v7 = vpop.eup %1128 }
 0xcc0   :  { %556 = vrot.lane.b32.xlu1 %v1129_v7, %s1156_s15 }
 0xcc4   :  { %561 = vrot.lane.b32.xlu1 %v553_v6, %s1158_s17 }
 0xd32   :  { %v557_v10 = vpop.permute.xlu1 %556 }
 0xd33   :  { %v1311_v11 = vmul.f32 %v1127_v63, %v557_v10 }
 0xd35   :  { %566 = vrot.lane.b32.xlu0 %v1311_v11, %s1157_s16 }
 0xd36   :  { %v562_v12 = vpop.permute.xlu1 %561 }
 0xd37   :  { %564 = vst.msk [vmem:[#allocation3] sm:$0xff] %vm16_vm0, %v562_v12 }
 0xd3e   :  { %v650_v13 = vld [vmem:[#allocation3] sm:$0xff] }
 0xd3f   :  { %652 = vrot.lane.b32.xlu1 %v650_v13, %s1157_s16 }
 0xda7   :  { %v567_v14 = vpop.permute.xlu0 %566 }
 0xda8   :  { %569 = vst.msk [vmem:[#allocation2] sm:$0xff] %vm16_vm0, %v567_v14 }
 0xdaf   :  { %v581_v15 = vld [vmem:[#allocation2] sm:$0xff] }
 0xdb0   :  { %v582_v16 = vpack.c.bf16 %v581_v15, %v581_v15 }
 0xdb1   :  { %v653_v32 = vpop.permute.xlu1 %652 }
 0xdb2   :  { %1050 = vmatmul.mubr.msk.bf16.vlgmr.msra.gmra.mxu1 %vm16_vm0, %v582_v16 }
 0xdb3   :  { %1065 = vmatprep.mubr.msk.bf16.mxu1 %vm1155_vm1, %v1154_v0  ;;  %1062 = vmatpush3.bf16.msra.mxu1 %v1088_v3 }
 0xdb4   :  { %1063 = vmatprep.subr.bf16.mxu1 %v1154_v0  ;;  %v966_v0 = vld [vmem:[%s1425_s0 + $0x38] sm:$0xff] }
 0xdb7   :  { %1064 = vmatpush3.bf16.msra.mxu1 %v1089_v4 }
 0xe72   :  { %v636_v19 = vpop.f32.mrf.mxu1 }
 0xe73   :  { %v642_v20 = vadd.f32 %v952_v17, %v636_v19 }
 0xe74   :  { %v1051_v21 = vpop.f32.mrf.mxu1 }
 0xe75   :  { %1130 = vtanh.f32 %v642_v20  ;;  %v956_v25 = vmul.f32 -1.442695, %v642_v20 }
 0xe76   :  { %v639_v22 = vpop.f32.mrf.mxu1 }
 0xe77   :  { %1132 = vpow2.f32 %v956_v25 }
 0xe78   :  { %v1052_v23 = vpop.f32.mrf.mxu1 }
 0xe82   :  { %v1131_v24 = vpop.eup %1130 }
 0xe83   :  { %657 = vrot.lane.b32.xlu0 %v1131_v24, %s1156_s15 }
 0xe84   :  { %v1133_v26 = vpop.eup %1132 }
 0xe85   :  { %v646_v28 = vadd.f32 1.0, %v1133_v26  ;;  %v973_v26 = vpack.c.bf16 %v1211_v27, %v1211_v27 }
 0xe87   :  { %1134 = vrcp.f32 %v646_v28  ;;  %v975_v28 = vpack.c.bf16 %v1261_v18, %v1261_v18 }
 0xe94   :  { %v1135_v29 = vpop.eup %1134 }
 0xe95   :  { %v655_v33 = vmul.f32 %v1135_v29, %v653_v32 }
 0xef5   :  { %v658_v30 = vpop.permute.xlu0 %657 }
 0xef6   :  { %v660_v31 = vmul.f32 %v1135_v29, %v658_v30 }
 0xef8   :  { %662 = vrot.lane.b32.xlu0 %v660_v31, %s1157_s16 }
 0xf6a   :  { %v663_v34 = vpop.permute.xlu0 %662 }
 0xf6b   :  { %v665_v35 = vadd.f32 %v663_v34, %v655_v33 }
 0xf6d   :  { %1136 = vtanh.f32 %v665_v35 }
 0xf7a   :  { %v1137_v36 = vpop.eup %1136 }
 0xf7b   :  { %668 = vrot.lane.b32.xlu1 %v1137_v36, %s1156_s15 }
 0xf7f   :  { %673 = vrot.lane.b32.xlu1 %v665_v35, %s1158_s17 }
 0xfed   :  { %v669_v39 = vpop.permute.xlu1 %668 }
 0xfee   :  { %v1335_v40 = vmul.f32 %v1135_v29, %v669_v39  ;;  %v977_v29 = vpack.c.bf16 %v1311_v11, %v1311_v11 }
 0xff0   :  { %678 = vrot.lane.b32.xlu0 %v1335_v40, %s1157_s16  ;;  %v978_v39 = vpack.c.bf16 %v1335_v40, %v1335_v40 }
 0xff1   :  { %v674_v41 = vpop.permute.xlu1 %673 }
 0xff2   :  { %676 = vst.msk [vmem:[#allocation3] sm:$0xff] %vm16_vm0, %v674_v41 }
 0xff9   :  { %v762_v42 = vld [vmem:[#allocation3] sm:$0xff] }
 0xffa   :  { %764 = vrot.lane.b32.xlu1 %v762_v42, %s1157_s16 }
0x1062   :  { %v679_v43 = vpop.permute.xlu0 %678 }
0x1063   :  { %681 = vst.msk [vmem:[#allocation2] sm:$0xff] %vm16_vm0, %v679_v43 }
0x106a   :  { %v693_v44 = vld [vmem:[#allocation2] sm:$0xff] }
0x106b   :  { %v694_v45 = vpack.c.bf16 %v693_v44, %v693_v44 }
0x106c   :  { %v765_v61 = vpop.permute.xlu1 %764 }
0x106d   :  { %1058 = vmatmul.mubr.msk.bf16.vlgmr.msra.gmra.mxu0 %vm16_vm0, %v694_v45 }
0x112d   :  { %v748_v48 = vpop.f32.mrf.mxu0 }
0x112e   :  { %v754_v49 = vadd.f32 %v959_v47, %v748_v48 }
0x112f   :  { %v1059_v50 = vpop.f32.mrf.mxu0 }
0x1130   :  { %1138 = vtanh.f32 %v754_v49  ;;  %v963_v55 = vmul.f32 -1.442695, %v754_v49 }
0x1131   :  { %v751_v51 = vpop.f32.mrf.mxu0 }
0x1132   :  { %1140 = vpow2.f32 %v963_v55 }
0x1133   :  { %v1060_v52 = vpop.f32.mrf.mxu0 }
0x113d   :  { %v1139_v53 = vpop.eup %1138 }
0x113e   :  { %769 = vrot.lane.b32.xlu0 %v1139_v53, %s1156_s15 }
0x113f   :  { %v1141_v56 = vpop.eup %1140 }
0x1140   :  { %v758_v57 = vadd.f32 1.0, %v1141_v56 }
0x1142   :  { %1142 = vrcp.f32 %v758_v57 }
0x114f   :  { %v1143_v58 = vpop.eup %1142 }
0x1150   :  { %v767_v62 = vmul.f32 %v1143_v58, %v765_v61 }
0x11b0   :  { %v770_v59 = vpop.permute.xlu0 %769 }
0x11b1   :  { %v772_v60 = vmul.f32 %v1143_v58, %v770_v59 }
0x11b3   :  { %774 = vrot.lane.b32.xlu0 %v772_v60, %s1157_s16 }
0x1225   :  { %v775_v63 = vpop.permute.xlu0 %774 }
0x1226   :  { %v777_v1 = vadd.f32 %v775_v63, %v767_v62 }
0x1228   :  { %1144 = vtanh.f32 %v777_v1 }
0x1235   :  { %v1145_v2 = vpop.eup %1144 }
0x1236   :  { %780 = vrot.lane.b32.xlu1 %v1145_v2, %s1156_s15 }
0x123a   :  { %785 = vrot.lane.b32.xlu1 %v777_v1, %s1158_s17 }
0x12a8   :  { %v781_v5 = vpop.permute.xlu1 %780 }
0x12a9   :  { %v783_v6 = vmul.f32 %v1143_v58, %v781_v5 }
0x12ab   :  { %790 = vrot.lane.b32.xlu0 %v783_v6, %s1157_s16  ;;  %v979_v30 = vpack.c.bf16 %v783_v6, %v783_v6 }
0x12ac   :  { %v786_v7 = vpop.permute.xlu1 %785 }
0x12ad   :  { %788 = vst.msk [vmem:[#allocation3] sm:$0xff] %vm16_vm0, %v786_v7 }
0x12b4   :  { %v874_v8 = vld [vmem:[#allocation3] sm:$0xff] }
0x12b5   :  { %876 = vrot.lane.b32.xlu1 %v874_v8, %s1157_s16 }
0x131d   :  { %v791_v9 = vpop.permute.xlu0 %790 }
0x131e   :  { %793 = vst.msk [vmem:[#allocation2] sm:$0xff] %vm16_vm0, %v791_v9 }
0x1325   :  { %v805_v10 = vld [vmem:[#allocation2] sm:$0xff] }
0x1326   :  { %v806_v12 = vpack.c.bf16 %v805_v10, %v805_v10 }
0x1327   :  { %v877_v31 = vpop.permute.xlu1 %876 }
0x1328   :  { %1066 = vmatmul.mubr.msk.bf16.vlgmr.msra.gmra.mxu1 %vm16_vm0, %v806_v12 }
0x13e8   :  { %v860_v13 = vpop.f32.mrf.mxu1 }
0x13e9   :  { %v866_v14 = vadd.f32 %v966_v0, %v860_v13 }
0x13ea   :  { %v1067_v15 = vpop.f32.mrf.mxu1 }
0x13eb   :  { %1146 = vtanh.f32 %v866_v14  ;;  %v970_v20 = vmul.f32 -1.442695, %v866_v14 }
0x13ec   :  { %v863_v16 = vpop.f32.mrf.mxu1 }
0x13ed   :  { %1148 = vpow2.f32 %v970_v20 }
0x13ee   :  { %v1068_v17 = vpop.f32.mrf.mxu1 }
0x13f8   :  { %v1147_v19 = vpop.eup %1146 }
0x13f9   :  { %881 = vrot.lane.b32.xlu0 %v1147_v19, %s1156_s15 }
0x13fa   :  { %v1149_v21 = vpop.eup %1148 }
0x13fb   :  { %v870_v22 = vadd.f32 1.0, %v1149_v21 }
0x13fd   :  { %1150 = vrcp.f32 %v870_v22 }
0x140a   :  { %v1151_v23 = vpop.eup %1150 }
0x140b   :  { %v879_v32 = vmul.f32 %v1151_v23, %v877_v31 }
0x146b   :  { %v882_v24 = vpop.permute.xlu0 %881 }
0x146c   :  { %v884_v25 = vmul.f32 %v1151_v23, %v882_v24 }
0x146e   :  { %886 = vrot.lane.b32.xlu0 %v884_v25, %s1157_s16 }
0x1472   :  { %126 = vrot.lane.b32.xlu0 %v973_v26, %s1157_s16 }
0x1476   :  { %350 = vrot.lane.b32.xlu0 %v975_v28, %s1157_s16 }
0x147a   :  { %574 = vrot.lane.b32.xlu0 %v977_v29, %s1157_s16 }
0x147e   :  { %798 = vrot.lane.b32.xlu0 %v979_v30, %s1157_s16 }
0x14e0   :  { %v887_v33 = vpop.permute.xlu0 %886 }
0x14e1   :  { %v889_v34 = vadd.f32 %v887_v33, %v879_v32 }
0x14e3   :  { %1152 = vtanh.f32 %v889_v34 }
0x14e4   :  { %v127_v27 = vpop.permute.xlu0 %126 }
0x14e5   :  { %130 = vst.msk [vmem:[%s1426_s2] sm:$0xf] %vm129_vm2, %v127_v27 }
0x14e8   :  { %v351_v18 = vpop.permute.xlu0 %350 }
0x14e9   :  { %937 = vst.msk [vmem:[%s1426_s2 + $0x8] sm:$0xf] %vm129_vm2, %v351_v18 }
0x14ec   :  { %v575_v11 = vpop.permute.xlu0 %574 }
0x14ed   :  { %951 = vst.msk [vmem:[%s1426_s2 + $0x10] sm:$0xf] %vm129_vm2, %v575_v11 }
0x14f0   :  { %v1153_v35 = vpop.eup %1152  ;;  %v799_v36 = vpop.permute.xlu0 %798 }
0x14f1   :  { %965 = vst.msk [vmem:[%s1426_s2 + $0x18] sm:$0xf] %vm129_vm2, %v799_v36  ;;  %892 = vrot.lane.b32.xlu1 %v1153_v35, %s1156_s15 }
0x14f5   :  { %238 = vrot.lane.b32.xlu1 %v974_v37, %s1157_s16 }
0x14f9   :  { %462 = vrot.lane.b32.xlu1 %v976_v38, %s1157_s16 }
0x14fd   :  { %686 = vrot.lane.b32.xlu1 %v978_v39, %s1157_s16 }
0x1501   :  { %897 = vrot.lane.b32.xlu1 %v889_v34, %s1158_s17 }
0x1563   :  { %v893_v41 = vpop.permute.xlu1 %892 }
0x1564   :  { %v895_v42 = vmul.f32 %v1151_v23, %v893_v41 }
0x1566   :  { %v980_v43 = vpack.c.bf16 %v895_v42, %v895_v42  ;;  %902 = vrot.lane.b32.xlu0 %v895_v42, %s1157_s16 }
0x1567   :  { %v239_v54 = vpop.permute.xlu1 %238 }
0x1568   :  { %930 = vst.msk [vmem:[%s1426_s2 + $0x4] sm:$0xf] %vm129_vm2, %v239_v54  ;;  %910 = vrot.lane.b32.xlu1 %v980_v43, %s1157_s16 }
0x156b   :  { %v463_v46 = vpop.permute.xlu1 %462 }
0x156c   :  { %944 = vst.msk [vmem:[%s1426_s2 + $0xc] sm:$0xf] %vm129_vm2, %v463_v46 }
0x156f   :  { %v687_v40 = vpop.permute.xlu1 %686 }
0x1570   :  { %958 = vst.msk [vmem:[%s1426_s2 + $0x14] sm:$0xf] %vm129_vm2, %v687_v40 }
0x1573   :  { %v898_v44 = vpop.permute.xlu1 %897 }
0x1574   :  { %900 = vst.msk [vmem:[#allocation3] sm:$0xff] %vm16_vm0, %v898_v44 }
0x15d8   :  { %v903_v45 = vpop.permute.xlu0 %902 }
0x15d9   :  { %905 = vst.msk [vmem:[#allocation2] sm:$0xff] %vm16_vm0, %v903_v45 }
0x15da   :  { %v911_v47 = vpop.permute.xlu1 %910 }
0x15db   :  { %972 = vst.msk [vmem:[%s1426_s2 + $0x1c] sm:$0xf] %vm129_vm2, %v911_v47 }

// kernel: rnn_model_forward.9
= control target key start
LH: loop header
LB: loop body
LE: loop exit
PB: predicated region body
PF: predicated region fallthrough
CT: control target
= control target key end

     0   :  { %vm101_vm0 = vcmask 261120   ;;  %vm25_vm1 = vcmask 7168   ;;  %v628_v6 = vmov -inf   ;;  %v629_v23 = vmov 0   ;;  %s946_s3 = inlined_call_operand.vmem [shape: bf16[32,128], index: 3, kind: input, shape index: {}]   ;;  %s947_s0 = inlined_call_operand.vmem [shape: bf16[64,32], index: 0, kind: input, shape index: {}]   ;;  %s948_s4 = inlined_call_operand.vmem [shape: f32[1,128], index: 4, kind: input, shape index: {}]   ;;  %s949_s1 = inlined_call_operand.vmem [shape: s32[64,1], index: 1, kind: input, shape index: {}]   ;;  %s950_s2 = inlined_call_operand.vmem [shape: f32[64,1], index: 2, kind: input, shape index: {}]   ;;  %s951_s5 = inlined_call_operand.vmem [shape: f32[64,1], index: 5, kind: output, shape index: {}]  }
   0x1   :  { %v574_v0 = vld [vmem:[%s946_s3 + $0x8] sm:$0xff]   ;;  %v575_v1 = vld [vmem:[%s946_s3] sm:$0xff]   ;;  %v577_v3 = vld [vmem:[%s947_s0 + $0x10] sm:$0xff]   ;;  %28 = vst.msk [vmem:[#allocation2 + $0x10] sm:$0xff] %vm25_vm1, %v628_v6  ;;  %573 = vset.pattern.permute.xlu1 %v629_v23  ;;  %572 = vset.pattern.permute.xlu0 %v629_v23  ;;  %v630_v25 = vmov 0.0  }
   0x2   :  { %553 = vmatprep.subr.bf16.mxu0 %v574_v0  ;;  %565 = vmatprep.subr.bf16.mxu1 %v574_v0  ;;  %v576_v2 = vld [vmem:[%s947_s0] sm:$0xff]   ;;  %v578_v4 = vld [vmem:[%s947_s0 + $0x8] sm:$0xff]   ;;  %v579_v5 = vld [vmem:[%s947_s0 + $0x18] sm:$0xff]   ;;  %26 = vst.msk [vmem:[#allocation2] sm:$0xff] %vm25_vm1, %v628_v6 }
   0x3   :  { %554 = vmatpush3.bf16.msra.mxu0 %v574_v0  ;;  %567 = vmatpush3.bf16.msra.mxu1 %v574_v0  ;;  %27 = vst.msk [vmem:[#allocation2 + $0x8] sm:$0xff] %vm25_vm1, %v628_v6  ;;  %29 = vst.msk [vmem:[#allocation2 + $0x18] sm:$0xff] %vm25_vm1, %v628_v6  ;;  %v536_v7 = vld [vmem:[%s948_s4] ss:$0 sm:$0xff]  ;;  %v370_v40 = vld [vmem:[%s949_s1 + $0x8] sm:$0xff] }
   0x4   :  { %555 = vmatprep.subr.bf16.mxu0 %v575_v1  ;;  %566 = vmatprep.subr.bf16.mxu1 %v575_v1  ;;  %30 = vst.msk [vmem:[#allocation2 + $0x20] sm:$0xff] %vm25_vm1, %v628_v6  ;;  %31 = vst.msk [vmem:[#allocation2 + $0x28] sm:$0xff] %vm25_vm1, %v628_v6  ;;  %v372_v49 = vld [vmem:[%s949_s1 + $0x18] sm:$0xff]  ;;  %v374_v57 = vld [vmem:[%s949_s1 + $0x28] sm:$0xff] }
   0x5   :  { %557 = vmatprep.mubr.msk.bf16.mxu0 %vm101_vm0, %v576_v2  ;;  %561 = vmatprep.mubr.msk.bf16.mxu1 %vm101_vm0, %v577_v3  ;;  %32 = vst.msk [vmem:[#allocation2 + $0x30] sm:$0xff] %vm25_vm1, %v628_v6  ;;  %33 = vst.msk [vmem:[#allocation2 + $0x38] sm:$0xff] %vm25_vm1, %v628_v6  ;;  %v376_v61 = vld [vmem:[%s949_s1 + $0x38] sm:$0xff]  ;;  %v369_v62 = vld [vmem:[%s949_s1] sm:$0xff] }
   0x6   :  { %36 = vst.msk [vmem:[#allocation3 + $0x10] sm:$0xff] %vm25_vm1, %v630_v25  ;;  %34 = vst.msk [vmem:[#allocation3] sm:$0xff] %vm25_vm1, %v630_v25  ;;  %v371_v63 = vld [vmem:[%s949_s1 + $0x10] sm:$0xff]  ;;  %v373_v0 = vld [vmem:[%s949_s1 + $0x20] sm:$0xff] }
   0x7   :  { %556 = vmatpush3.bf16.msra.mxu0 %v575_v1  ;;  %568 = vmatpush3.bf16.msra.mxu1 %v575_v1  ;;  %35 = vst.msk [vmem:[#allocation3 + $0x8] sm:$0xff] %vm25_vm1, %v630_v25  ;;  %37 = vst.msk [vmem:[#allocation3 + $0x18] sm:$0xff] %vm25_vm1, %v630_v25  ;;  %v375_v1 = vld [vmem:[%s949_s1 + $0x30] sm:$0xff] }
   0x8   :  { %38 = vst.msk [vmem:[#allocation3 + $0x20] sm:$0xff] %vm25_vm1, %v630_v25  ;;  %39 = vst.msk [vmem:[#allocation3 + $0x28] sm:$0xff] %vm25_vm1, %v630_v25  ;;  %v730_v26 = vld [vmem:[#allocation2 + $0x10] sm:$0xff] }
   0x9   :  { %40 = vst.msk [vmem:[#allocation3 + $0x30] sm:$0xff] %vm25_vm1, %v630_v25  ;;  %41 = vst.msk [vmem:[#allocation3 + $0x38] sm:$0xff] %vm25_vm1, %v630_v25  ;;  %v732_v28 = vld [vmem:[#allocation2] sm:$0xff] }
   0xa   :  { %558 = vmatmul.mubr.msk.bf16.vlgmr.msra.gmra.mxu0 %vm101_vm0, %v578_v4  ;;  %562 = vmatmul.mubr.msk.bf16.vlgmr.msra.gmra.mxu1 %vm101_vm0, %v579_v5  ;;  %42 = vst.msk [vmem:[#allocation4] sm:$0xff] %vm25_vm1, %v630_v25  ;;  %43 = vst.msk [vmem:[#allocation4 + $0x8] sm:$0xff] %vm25_vm1, %v630_v25  ;;  %v737_v31 = vld [vmem:[#allocation2 + $0x18] sm:$0xff]  ;;  %v769_v44 = vld [vmem:[#allocation2 + $0x8] sm:$0xff] }
   0xb   :  { %44 = vst.msk [vmem:[#allocation4 + $0x10] sm:$0xff] %vm25_vm1, %v630_v25  ;;  %45 = vst.msk [vmem:[#allocation4 + $0x18] sm:$0xff] %vm25_vm1, %v630_v25  ;;  %v747_v35 = vld [vmem:[#allocation2 + $0x20] sm:$0xff]  ;;  %v757_v39 = vld [vmem:[#allocation2 + $0x28] sm:$0xff] }
   0xc   :  { %46 = vst.msk [vmem:[#allocation4 + $0x20] sm:$0xff] %vm25_vm1, %v630_v25  ;;  %47 = vst.msk [vmem:[#allocation4 + $0x28] sm:$0xff] %vm25_vm1, %v630_v25  ;;  %v778_v48 = vld [vmem:[#allocation2 + $0x38] sm:$0xff]  ;;  %v790_v53 = vld [vmem:[#allocation2 + $0x30] sm:$0xff] }
   0xd   :  { %48 = vst.msk [vmem:[#allocation4 + $0x30] sm:$0xff] %vm25_vm1, %v630_v25  ;;  %49 = vst.msk [vmem:[#allocation4 + $0x38] sm:$0xff] %vm25_vm1, %v630_v25 }
  0xca   :  { %v559_v8 = vpop.f32.mrf.mxu0  ;;  %v563_v9 = vpop.f32.mrf.mxu1 }
  0xcb   :  { %v690_v10 = vadd.f32 %v559_v8, %v536_v7  ;;  %v710_v24 = vadd.f32 %v563_v9, %v536_v7 }
  0xcc   :  { %v148_v11 = vpop.f32.mrf.mxu0  ;;  %v164_v12 = vpop.f32.mrf.mxu1 }
  0xcd   :  { %v692_v13 = vadd.f32 %v536_v7, %v148_v11  ;;  %191 = vmax.xlane.f32.xlu1 %v690_v10  ;;  %v698_v18 = vadd.f32 %v536_v7, %v164_v12 }
  0xce   :  { %v560_v14 = vpop.f32.mrf.mxu0  ;;  %v564_v15 = vpop.f32.mrf.mxu1 }
  0xcf   :  { %v695_v16 = vadd.f32 %v560_v14, %v536_v7  ;;  %187 = vmax.xlane.f32.xlu0 %v692_v13  ;;  %v707_v22 = vadd.f32 %v564_v15, %v536_v7 }
  0xd0   :  { %v167_v17 = vpop.f32.mrf.mxu1  ;;  %v151_v19 = vpop.f32.mrf.mxu0 }
  0xd1   :  { %193 = vmax.xlane.f32.xlu1 %v695_v16  ;;  %v701_v20 = vadd.f32 %v536_v7, %v167_v17  ;;  %v704_v21 = vadd.f32 %v536_v7, %v151_v19 }
  0xd3   :  { %195 = vmax.xlane.f32.xlu0 %v698_v18 }
  0xd5   :  { %197 = vmax.xlane.f32.xlu1 %v701_v20 }
  0xd7   :  { %189 = vmax.xlane.f32.xlu0 %v704_v21 }
  0xd9   :  { %201 = vmax.xlane.f32.xlu1 %v707_v22 }
  0xdb   :  { %199 = vmax.xlane.f32.xlu0 %v710_v24 }
 0x156   :  { %v192_v27 = vpop.xlane.xlu1 %191 }
 0x157   :  { %v735_v29 = vmax.f32 %v730_v26, %v192_v27 }
 0x158   :  { %v188_v30 = vpop.xlane.xlu0 %187 }
 0x159   :  { %v213_v32 = vsub.f32 %v730_v26, %v735_v29  ;;  %350 = vst.msk [vmem:[#allocation2 + $0x10] sm:$0xff] %vm25_vm1, %v735_v29  ;;  %v744_v33 = vmax.f32 %v732_v28, %v188_v30  ;;  %263 = vperm.xlu1 %573, %v735_v29  }
 0x15a   :  { %v194_v34 = vpop.xlane.xlu1 %193 }
 0x15b   :  { %v211_v36 = vsub.f32 %v732_v28, %v744_v33  ;;  %348 = vst.msk [vmem:[#allocation2] sm:$0xff] %vm25_vm1, %v744_v33  ;;  %v754_v37 = vmax.f32 %v737_v31, %v194_v34  ;;  %253 = vperm.xlu0 %572, %v744_v33  }
 0x15c   :  { %v196_v38 = vpop.xlane.xlu0 %195 }
 0x15d   :  { %v214_v41 = vsub.f32 %v737_v31, %v754_v37  ;;  %351 = vst.msk [vmem:[#allocation2 + $0x18] sm:$0xff] %vm25_vm1, %v754_v37  ;;  %v767_v42 = vmax.f32 %v747_v35, %v196_v38 }
 0x15e   :  { %v198_v43 = vpop.xlane.xlu1 %197 }
 0x15f   :  { %v215_v45 = vsub.f32 %v747_v35, %v767_v42  ;;  %352 = vst.msk [vmem:[#allocation2 + $0x20] sm:$0xff] %vm25_vm1, %v767_v42  ;;  %v776_v46 = vmax.f32 %v757_v39, %v198_v43  ;;  %381 = vperm.xlu0 %572, %v370_v40   ;;  %v225_v26 = vmul.f32 1.442695, %v214_v41 }
 0x160   :  { %v190_v47 = vpop.xlane.xlu0 %189 }
 0x161   :  { %v216_v50 = vsub.f32 %v757_v39, %v776_v46  ;;  %353 = vst.msk [vmem:[#allocation2 + $0x28] sm:$0xff] %vm25_vm1, %v776_v46  ;;  %v788_v51 = vmax.f32 %v769_v44, %v190_v47 }
 0x162   :  { %v202_v52 = vpop.xlane.xlu1 %201 }
 0x163   :  { %v212_v54 = vsub.f32 %v769_v44, %v788_v51  ;;  %349 = vst.msk [vmem:[#allocation2 + $0x8] sm:$0xff] %vm25_vm1, %v788_v51  ;;  %v797_v55 = vmax.f32 %v778_v48, %v202_v52  ;;  %387 = vperm.xlu0 %572, %v372_v49  }
 0x164   :  { %v200_v56 = vpop.xlane.xlu0 %199 }
 0x165   :  { %v218_v58 = vsub.f32 %v778_v48, %v797_v55  ;;  %355 = vst.msk [vmem:[#allocation2 + $0x38] sm:$0xff] %vm25_vm1, %v797_v55  ;;  %v807_v59 = vmax.f32 %v790_v53, %v200_v56  ;;  %v221_v35 = vmul.f32 1.442695, %v212_v54  ;;  %v238_v54 = vld [vmem:[#allocation3 + $0x18] sm:$0xff] }
 0x167   :  { %v217_v60 = vsub.f32 %v790_v53, %v807_v59  ;;  %354 = vst.msk [vmem:[#allocation2 + $0x30] sm:$0xff] %vm25_vm1, %v807_v59  ;;  %393 = vperm.xlu0 %572, %v374_v57   ;;  %283 = vperm.xlu1 %573, %v807_v59  }
 0x169   :  { %v231_v31 = vmul.f32 1.442695, %v217_v60  ;;  %v236_v60 = vld [vmem:[#allocation3 + $0x8] sm:$0xff] }
 0x16b   :  { %399 = vperm.xlu0 %572, %v376_v61   ;;  %273 = vperm.xlu1 %573, %v767_v42   ;;  %v239_v42 = vld [vmem:[#allocation3 + $0x20] sm:$0xff] }
 0x16f   :  { %268 = vperm.xlu1 %573, %v754_v37   ;;  %v233_v37 = vmul.f32 1.442695, %v218_v58 }
 0x173   :  { %258 = vperm.xlu1 %573, %v788_v51  }
 0x177   :  { %278 = vperm.xlu1 %573, %v776_v46  }
 0x17b   :  { %288 = vperm.xlu1 %573, %v797_v55  }
 0x17f   :  { %378 = vperm.xlu1 %573, %v369_v62  }
 0x183   :  { %384 = vperm.xlu1 %573, %v371_v63   ;;  %v356_v63 = vlaneseq }
 0x187   :  { %390 = vperm.xlu1 %573, %v373_v0  }
 0x18b   :  { %396 = vperm.xlu1 %573, %v375_v1  }
 0x1d4   :  { %v264_v2 = vpop.permute.xlu1 %263 }
 0x1d5   :  { %v293_v3 = vsub.f32 %v690_v10, %v264_v2 }
 0x1d6   :  { %v254_v4 = vpop.permute.xlu0 %253 }
 0x1d7   :  { %v303_v5 = vmul.f32 1.442695, %v293_v3  ;;  %v291_v6 = vsub.f32 %v692_v13, %v254_v4  ;;  %v357_v4 = vand.u32 127, %v356_v63 }
 0x1d9   :  { %580 = vpow2.f32 %v303_v5  ;;  %v299_v7 = vmul.f32 1.442695, %v291_v6 }
 0x1da   :  { %v382_v1 = vpop.permute.xlu0 %381 }
 0x1db   :  { %582 = vpow2.f32 %v299_v7  ;;  %vm402_vm3 = vcmp.eq.s32.totalorder %v357_v4, %v382_v1  ;;  %v242_v1 = vld [vmem:[#allocation3 + $0x38] sm:$0xff] }
 0x1de   :  { %v388_v6 = vpop.permute.xlu0 %387 }
 0x1df   :  { %vm404_vm5 = vcmp.eq.s32.totalorder %v357_v4, %v388_v6 }
 0x1e2   :  { %v284_v8 = vpop.permute.xlu1 %283 }
 0x1e3   :  { %v297_v25 = vsub.f32 %v710_v24, %v284_v8 }
 0x1e5   :  { %v311_v38 = vmul.f32 1.442695, %v297_v25 }
 0x1e6   :  { %v581_v9 = vpop.eup %580  ;;  %v274_v11 = vpop.permute.xlu1 %273 }
 0x1e7   :  { %v295_v12 = vsub.f32 %v698_v18, %v274_v11  ;;  %319 = vadd.xlane.f32.xlu0 %v581_v9  ;;  %v394_v11 = vpop.permute.xlu0 %393 }
 0x1e8   :  { %v583_v14 = vpop.eup %582  ;;  %vm406_vm7 = vcmp.eq.s32.totalorder %v357_v4, %v394_v11 }
 0x1e9   :  { %v307_v15 = vmul.f32 1.442695, %v295_v12  ;;  %315 = vadd.xlane.f32.xlu1 %v583_v14  ;;  %v410_v14 = vsel %vm402_vm3, %v704_v21, 0.0 }
 0x1ea   :  { %v269_v17 = vpop.permute.xlu1 %268 }
 0x1eb   :  { %584 = vpow2.f32 %v307_v15  ;;  %v294_v19 = vsub.f32 %v695_v16, %v269_v17 }
 0x1ed   :  { %v305_v23 = vmul.f32 1.442695, %v294_v19  ;;  %v412_v19 = vsel %vm404_vm5, %v695_v16, 0.0  ;;  %v219_v16 = vmul.f32 1.442695, %v211_v36 }
 0x1ee   :  { %v259_v27 = vpop.permute.xlu1 %258  ;;  %v229_v36 = vmul.f32 1.442695, %v216_v50 }
 0x1ef   :  { %586 = vpow2.f32 %v305_v23  ;;  %v292_v30 = vsub.f32 %v704_v21, %v259_v27 }
 0x1f1   :  { %v301_v34 = vmul.f32 1.442695, %v292_v30  ;;  %v235_v30 = vld [vmem:[#allocation3] sm:$0xff] }
 0x1f2   :  { %v279_v40 = vpop.permute.xlu1 %278 }
 0x1f3   :  { %588 = vpow2.f32 %v301_v34  ;;  %v296_v43 = vsub.f32 %v701_v20, %v279_v40 }
 0x1f4   :  { %590 = vpow2.f32 %v311_v38 }
 0x1f5   :  { %v309_v47 = vmul.f32 1.442695, %v296_v43 }
 0x1f6   :  { %v289_v49 = vpop.permute.xlu1 %288 }
 0x1f7   :  { %592 = vpow2.f32 %v309_v47  ;;  %v298_v52 = vsub.f32 %v707_v22, %v289_v49  ;;  %v240_v47 = vld [vmem:[#allocation3 + $0x28] sm:$0xff]  ;;  %v241_v49 = vld [vmem:[#allocation3 + $0x30] sm:$0xff] }
 0x1f8   :  { %v585_v56 = vpop.eup %584 }
 0x1f9   :  { %v313_v57 = vmul.f32 1.442695, %v298_v52  ;;  %323 = vadd.xlane.f32.xlu0 %v585_v56 }
 0x1fa   :  { %v379_v62 = vpop.permute.xlu1 %378 }
 0x1fb   :  { %594 = vpow2.f32 %v313_v57  ;;  %vm401_vm2 = vcmp.eq.s32.totalorder %v357_v4, %v379_v62 }
 0x1fc   :  { %v587_v61 = vpop.eup %586  ;;  %v409_v9 = vsel %vm401_vm2, %v692_v13, 0.0  ;;  %v400_v13 = vpop.permute.xlu0 %399 }
 0x1fd   :  { %321 = vadd.xlane.f32.xlu1 %v587_v61  ;;  %vm408_vm9 = vcmp.eq.s32.totalorder %v357_v4, %v400_v13 }
 0x1fe   :  { %v385_v2 = vpop.permute.xlu1 %384  ;;  %v416_v21 = vsel %vm408_vm9, %v707_v22, 0.0 }
 0x1ff   :  { %vm403_vm4 = vcmp.eq.s32.totalorder %v357_v4, %v385_v2 }
 0x200   :  { %v589_v0 = vpop.eup %588  ;;  %v411_v12 = vsel %vm403_vm4, %v690_v10, 0.0  ;;  %v414_v10 = vsel %vm406_vm7, %v701_v20, 0.0  ;;  %v227_v20 = vmul.f32 1.442695, %v215_v45 }
 0x201   :  { %317 = vadd.xlane.f32.xlu0 %v589_v0  ;;  %v591_v3 = vpop.eup %590 }
 0x202   :  { %v391_v8 = vpop.permute.xlu1 %390 }
 0x203   :  { %vm405_vm6 = vcmp.eq.s32.totalorder %v357_v4, %v391_v8 }
 0x204   :  { %v593_v5 = vpop.eup %592  ;;  %v413_v17 = vsel %vm405_vm6, %v698_v18, 0.0  ;;  %v223_v18 = vmul.f32 1.442695, %v213_v32 }
 0x205   :  { %327 = vadd.xlane.f32.xlu0 %v591_v3  ;;  %325 = vadd.xlane.f32.xlu1 %v593_v5  ;;  %v361_v5 = vld [vmem:[#allocation4] sm:$0xff] }
 0x206   :  { %v397_v15 = vpop.permute.xlu1 %396  ;;  %596 = vpow2.f32 %v223_v18 }
 0x207   :  { %vm407_vm8 = vcmp.eq.s32.totalorder %v357_v4, %v397_v15  ;;  %598 = vpow2.f32 %v219_v16  ;;  %v362_v15 = vld [vmem:[#allocation4 + $0x8] sm:$0xff]  ;;  %v364_v16 = vld [vmem:[#allocation4 + $0x18] sm:$0xff] }
 0x208   :  { %v595_v7 = vpop.eup %594  ;;  %v415_v23 = vsel %vm407_vm8, %v710_v24, 0.0  ;;  %v237_v24 = vld [vmem:[#allocation3 + $0x10] sm:$0xff]  ;;  %600 = vpow2.f32 %v227_v20  ;;  %v365_v20 = vld [vmem:[#allocation4 + $0x20] sm:$0xff] }
 0x209   :  { %417 = vadd.xlane.f32.xlu0 %v409_v9  ;;  %329 = vadd.xlane.f32.xlu1 %v595_v7  ;;  %602 = vpow2.f32 %v225_v26 }
 0x20a   :  { %604 = vpow2.f32 %v221_v35  ;;  %v366_v35 = vld [vmem:[#allocation4 + $0x28] sm:$0xff] }
 0x20b   :  { %606 = vpow2.f32 %v229_v36 }
 0x20c   :  { %608 = vpow2.f32 %v231_v31 }
 0x20d   :  { %421 = vadd.xlane.f32.xlu0 %v411_v12  ;;  %419 = vadd.xlane.f32.xlu1 %v410_v14  ;;  %610 = vpow2.f32 %v233_v37  ;;  %v367_v37 = vld [vmem:[#allocation4 + $0x30] sm:$0xff] }
 0x211   :  { %425 = vadd.xlane.f32.xlu0 %v413_v17  ;;  %423 = vadd.xlane.f32.xlu1 %v412_v19  ;;  %v363_v17 = vld [vmem:[#allocation4 + $0x10] sm:$0xff] }
 0x213   :  { %v597_v25 = vpop.eup %596 }
 0x214   :  { %v599_v27 = vpop.eup %598  ;;  %v245_v22 = vmul.f32 %v597_v25, %v237_v24 }
 0x215   :  { %429 = vadd.xlane.f32.xlu0 %v415_v23  ;;  %427 = vadd.xlane.f32.xlu1 %v414_v10  ;;  %v243_v28 = vmul.f32 %v599_v27, %v235_v30  ;;  %v601_v41 = vpop.eup %600  ;;  %v452_v27 = vld [vmem:[#allocation2] sm:$0xff] }
 0x216   :  { %v247_v44 = vmul.f32 %v601_v41, %v239_v42  ;;  %v603_v45 = vpop.eup %602  ;;  %v454_v41 = vld [vmem:[#allocation2 + $0x10] sm:$0xff] }
 0x217   :  { %v246_v50 = vmul.f32 %v603_v45, %v238_v54  ;;  %v605_v53 = vpop.eup %604 }
 0x218   :  { %v607_v55 = vpop.eup %606  ;;  %v244_v58 = vmul.f32 %v605_v53, %v236_v60  ;;  %v510_v60 = vld [vmem:[%s950_s2 + $0x10] sm:$0xff] }
 0x219   :  { %431 = vadd.xlane.f32.xlu1 %v416_v21  ;;  %v609_v40 = vpop.eup %608  ;;  %v248_v57 = vmul.f32 %v607_v55, %v240_v47  ;;  %v456_v55 = vld [vmem:[#allocation2 + $0x20] sm:$0xff] }
 0x21a   :  { %v249_v61 = vmul.f32 %v609_v40, %v241_v49  ;;  %v611_v62 = vpop.eup %610 }
 0x21b   :  { %v250_v6 = vmul.f32 %v611_v62, %v242_v1  ;;  %v511_v62 = vld [vmem:[%s950_s2 + $0x18] sm:$0xff]  ;;  %v512_v1 = vld [vmem:[%s950_s2 + $0x20] sm:$0xff] }
 0x270   :  { %v320_v34 = vpop.xlane.xlu0 %319 }
 0x271   :  { %v333_v29 = vadd.f32 %v320_v34, %v245_v22 }
 0x272   :  { %v316_v32 = vpop.xlane.xlu1 %315 }
 0x273   :  { %342 = vst.msk [vmem:[#allocation3 + $0x10] sm:$0xff] %vm25_vm1, %v333_v29  ;;  %v331_v33 = vadd.f32 %v316_v32, %v243_v28  ;;  %v508_v28 = vld [vmem:[%s950_s2] sm:$0xff] }
 0x275   :  { %340 = vst.msk [vmem:[#allocation3] sm:$0xff] %vm25_vm1, %v331_v33 }
 0x27a   :  { %v462_v38 = vld [vmem:[#allocation3 + $0x10] sm:$0xff] }
 0x27c   :  { %v460_v46 = vld [vmem:[#allocation3] sm:$0xff] }
 0x27d   :  { %612 = vlog2.f32 %v460_v46 }
 0x27e   :  { %614 = vlog2.f32 %v462_v38 }
 0x282   :  { %v324_v51 = vpop.xlane.xlu0 %323 }
 0x283   :  { %v335_v39 = vadd.f32 %v324_v51, %v247_v44 }
 0x285   :  { %344 = vst.msk [vmem:[#allocation3 + $0x20] sm:$0xff] %vm25_vm1, %v335_v39 }
 0x286   :  { %v322_v59 = vpop.xlane.xlu1 %321 }
 0x287   :  { %v334_v48 = vadd.f32 %v322_v59, %v246_v50 }
 0x289   :  { %343 = vst.msk [vmem:[#allocation3 + $0x18] sm:$0xff] %vm25_vm1, %v334_v48  ;;  %v368_v48 = vld [vmem:[#allocation4 + $0x38] sm:$0xff] }
 0x28a   :  { %v318_v43 = vpop.xlane.xlu0 %317  ;;  %v613_v12 = vpop.eup %612 }
 0x28b   :  { %v332_v52 = vadd.f32 %v318_v43, %v244_v58  ;;  %v615_v23 = vpop.eup %614  ;;  %v469_v10 = vmul.f32 0.6931472, %v613_v12  ;;  %v455_v43 = vld [vmem:[#allocation2 + $0x18] sm:$0xff] }
 0x28c   :  { %v464_v56 = vld [vmem:[#allocation3 + $0x20] sm:$0xff]  ;;  %v473_v30 = vmul.f32 0.6931472, %v615_v23 }
 0x28d   :  { %341 = vst.msk [vmem:[#allocation3 + $0x8] sm:$0xff] %vm25_vm1, %v332_v52  ;;  %616 = vlog2.f32 %v464_v56  ;;  %v484_v29 = vadd.f32 %v469_v10, %v452_v27  ;;  %v453_v52 = vld [vmem:[#allocation2 + $0x8] sm:$0xff] }
 0x28e   :  { %v326_v63 = vpop.xlane.xlu1 %325  ;;  %v328_v0 = vpop.xlane.xlu0 %327  ;;  %v486_v45 = vadd.f32 %v473_v30, %v454_v41 }
 0x28f   :  { %v336_v2 = vadd.f32 %v326_v63, %v248_v57  ;;  %v337_v3 = vadd.f32 %v328_v0, %v249_v61 }
 0x290   :  { %v463_v4 = vld [vmem:[#allocation3 + $0x18] sm:$0xff] }
 0x291   :  { %618 = vlog2.f32 %v463_v4  ;;  %345 = vst.msk [vmem:[#allocation3 + $0x28] sm:$0xff] %vm25_vm1, %v336_v2  ;;  %346 = vst.msk [vmem:[#allocation3 + $0x30] sm:$0xff] %vm25_vm1, %v337_v3 }
 0x292   :  { %v330_v7 = vpop.xlane.xlu1 %329  ;;  %v418_v8 = vpop.xlane.xlu0 %417 }
 0x293   :  { %v338_v9 = vadd.f32 %v330_v7, %v250_v6  ;;  %v433_v11 = vadd.f32 %v418_v8, %v361_v5  ;;  %v509_v7 = vld [vmem:[%s950_s2 + $0x8] sm:$0xff] }
 0x294   :  { %v461_v14 = vld [vmem:[#allocation3 + $0x8] sm:$0xff] }
 0x295   :  { %620 = vlog2.f32 %v461_v14  ;;  %347 = vst.msk [vmem:[#allocation3 + $0x38] sm:$0xff] %vm25_vm1, %v338_v9  ;;  %441 = vst.msk [vmem:[#allocation4] sm:$0xff] %vm25_vm1, %v433_v11 }
 0x296   :  { %v420_v19 = vpop.xlane.xlu1 %419  ;;  %v422_v13 = vpop.xlane.xlu0 %421 }
 0x297   :  { %v434_v21 = vadd.f32 %v420_v19, %v362_v15  ;;  %v435_v18 = vadd.f32 %v422_v13, %v363_v17  ;;  %v457_v17 = vld [vmem:[#allocation2 + $0x28] sm:$0xff]  ;;  %v458_v13 = vld [vmem:[#allocation2 + $0x30] sm:$0xff] }
 0x298   :  { %v465_v25 = vld [vmem:[#allocation3 + $0x28] sm:$0xff]  ;;  %v466_v24 = vld [vmem:[#allocation3 + $0x30] sm:$0xff] }
 0x299   :  { %622 = vlog2.f32 %v465_v25  ;;  %442 = vst.msk [vmem:[#allocation4 + $0x8] sm:$0xff] %vm25_vm1, %v434_v21  ;;  %443 = vst.msk [vmem:[#allocation4 + $0x10] sm:$0xff] %vm25_vm1, %v435_v18  ;;  %v513_v18 = vld [vmem:[%s950_s2 + $0x28] sm:$0xff] }
 0x29a   :  { %624 = vlog2.f32 %v466_v24  ;;  %v424_v22 = vpop.xlane.xlu1 %423  ;;  %v426_v34 = vpop.xlane.xlu0 %425 }
 0x29b   :  { %v617_v26 = vpop.eup %616  ;;  %v436_v32 = vadd.f32 %v424_v22, %v364_v16  ;;  %v437_v33 = vadd.f32 %v426_v34, %v365_v20  ;;  %v514_v20 = vld [vmem:[%s950_s2 + $0x30] sm:$0xff]  ;;  %v459_v22 = vld [vmem:[#allocation2 + $0x38] sm:$0xff] }
 0x29c   :  { %v467_v36 = vld [vmem:[#allocation3 + $0x38] sm:$0xff]  ;;  %v492_v31 = vld [vmem:[#allocation4] sm:$0xff]  ;;  %v477_v51 = vmul.f32 0.6931472, %v617_v26 }
 0x29d   :  { %626 = vlog2.f32 %v467_v36  ;;  %v500_v42 = vsub.f32 %v484_v29, %v492_v31  ;;  %444 = vst.msk [vmem:[#allocation4 + $0x18] sm:$0xff] %vm25_vm1, %v436_v32  ;;  %445 = vst.msk [vmem:[#allocation4 + $0x20] sm:$0xff] %vm25_vm1, %v437_v33  ;;  %v515_v32 = vld [vmem:[%s950_s2 + $0x38] sm:$0xff] }
 0x29e   :  { %v619_v44 = vpop.eup %618  ;;  %v428_v54 = vpop.xlane.xlu1 %427  ;;  %v488_v47 = vadd.f32 %v477_v51, %v456_v55 }
 0x29f   :  { %v430_v39 = vpop.xlane.xlu0 %429  ;;  %v516_v46 = vmul.f32 %v508_v28, %v500_v42  ;;  %v475_v50 = vmul.f32 0.6931472, %v619_v44  ;;  %v438_v53 = vadd.f32 %v428_v54, %v366_v35 }
 0x2a0   :  { %v439_v59 = vadd.f32 %v430_v39, %v367_v37  ;;  %v494_v38 = vld [vmem:[#allocation4 + $0x10] sm:$0xff]  ;;  %v493_v8 = vld [vmem:[#allocation4 + $0x8] sm:$0xff] }
 0x2a1   :  { %524 = vst.msk [vmem:[%s951_s5] sm:$0xff] %vm25_vm1, %v516_v46  ;;  %v502_v58 = vsub.f32 %v486_v45, %v494_v38  ;;  %446 = vst.msk [vmem:[#allocation4 + $0x28] sm:$0xff] %vm25_vm1, %v438_v53  ;;  %v487_v61 = vadd.f32 %v475_v50, %v455_v43 }
 0x2a2   :  { %447 = vst.msk [vmem:[#allocation4 + $0x30] sm:$0xff] %vm25_vm1, %v439_v59  ;;  %v621_v40 = vpop.eup %620  ;;  %v432_v49 = vpop.xlane.xlu1 %431 }
 0x2a3   :  { %v471_v56 = vmul.f32 0.6931472, %v621_v40  ;;  %v518_v57 = vmul.f32 %v510_v60, %v502_v58  ;;  %v440_v63 = vadd.f32 %v432_v49, %v368_v48 }
 0x2a4   :  { %v495_v0 = vld [vmem:[#allocation4 + $0x18] sm:$0xff]  ;;  %v496_v2 = vld [vmem:[#allocation4 + $0x20] sm:$0xff] }
 0x2a5   :  { %v485_v3 = vadd.f32 %v471_v56, %v453_v52  ;;  %526 = vst.msk [vmem:[%s951_s5 + $0x10] sm:$0xff] %vm25_vm1, %v518_v57  ;;  %v503_v4 = vsub.f32 %v487_v61, %v495_v0  ;;  %v504_v5 = vsub.f32 %v488_v47, %v496_v2  ;;  %448 = vst.msk [vmem:[#allocation4 + $0x38] sm:$0xff] %vm25_vm1, %v440_v63 }
 0x2a6   :  { %v623_v6 = vpop.eup %622 }
 0x2a7   :  { %v625_v9 = vpop.eup %624  ;;  %v501_v11 = vsub.f32 %v485_v3, %v493_v8  ;;  %v519_v12 = vmul.f32 %v511_v62, %v503_v4  ;;  %v520_v14 = vmul.f32 %v512_v1, %v504_v5  ;;  %v479_v15 = vmul.f32 0.6931472, %v623_v6 }
 0x2a8   :  { %v481_v19 = vmul.f32 0.6931472, %v625_v9  ;;  %v497_v16 = vld [vmem:[#allocation4 + $0x28] sm:$0xff] }
 0x2a9   :  { %v517_v23 = vmul.f32 %v509_v7, %v501_v11  ;;  %527 = vst.msk [vmem:[%s951_s5 + $0x18] sm:$0xff] %vm25_vm1, %v519_v12  ;;  %528 = vst.msk [vmem:[%s951_s5 + $0x20] sm:$0xff] %vm25_vm1, %v520_v14  ;;  %v489_v10 = vadd.f32 %v479_v15, %v457_v17  ;;  %v498_v27 = vld [vmem:[#allocation4 + $0x30] sm:$0xff] }
 0x2aa   :  { %v627_v21 = vpop.eup %626  ;;  %v490_v25 = vadd.f32 %v481_v19, %v458_v13 }
 0x2ab   :  { %525 = vst.msk [vmem:[%s951_s5 + $0x8] sm:$0xff] %vm25_vm1, %v517_v23  ;;  %v505_v24 = vsub.f32 %v489_v10, %v497_v16  ;;  %v483_v30 = vmul.f32 0.6931472, %v627_v21 }
 0x2ac   :  { %v506_v34 = vsub.f32 %v490_v25, %v498_v27  ;;  %v499_v33 = vld [vmem:[#allocation4 + $0x38] sm:$0xff] }
 0x2ad   :  { %v521_v26 = vmul.f32 %v513_v18, %v505_v24  ;;  %v491_v29 = vadd.f32 %v483_v30, %v459_v22 }
 0x2ae   :  { %v522_v28 = vmul.f32 %v514_v20, %v506_v34 }
 0x2af   :  { %529 = vst.msk [vmem:[%s951_s5 + $0x28] sm:$0xff] %vm25_vm1, %v521_v26  ;;  %v507_v35 = vsub.f32 %v491_v29, %v499_v33 }
 0x2b0   :  { %530 = vst.msk [vmem:[%s951_s5 + $0x30] sm:$0xff] %vm25_vm1, %v522_v28 }
 0x2b1   :  { %v523_v36 = vmul.f32 %v515_v32, %v507_v35 }
 0x2b3   :  { %531 = vst.msk [vmem:[%s951_s5 + $0x38] sm:$0xff] %vm25_vm1, %v523_v36 }

</bundles_post_ra>
